<compile_context>
chip_gen: v7x
topology: tpu7x:2x2x1
jax: 0.10.0
libtpu: 0.0.40
codegen_flags: <defaults>
</compile_context>

<pallas_src>
import numpy as np
import jax
import jax.numpy as jnp
from jax import lax
from jax.experimental import pallas as pl
from jax.experimental.pallas import tpu as pltpu

EPS = 1e-5
NP = 8                       # batch padded to one sublane tile

# Architecture constants implied by the module (flatten = 3*3*32 => 28x28 in).
H0 = W0 = 28                 # input spatial
C1, H1, W1 = 8, 14, 14       # conv1 output
C2, H2, W2 = 16, 7, 7        # conv2 output
C3, H3, W3 = 32, 3, 3        # conv3 output
NH = 128                     # linear1 hidden width
L1 = W1 * C1                 # 112 (conv1 out lanes == conv2 in lanes)
L2 = W2 * C2                 # 112
L3 = W3 * C3                 # 96


# --------------------------- in-kernel helpers ------------------------------ #

def _conv3x3_s2_rows(a_pad, w_ref, ho):
    """3x3 stride-2 conv as 3 accumulated MXU matmuls.

    a_pad : (Hp, NP, L_in) H-padded activation, rows (h, n), lanes (w, cin),
            Hp even.
    w_ref : (3, L_in, L_out) band weight matrices (one per kernel row kh) that
            already fold the kw taps and the width padding.
    Returns the pre-activation as (ho*NP, L_out), rows (oh, n), lanes (ow, co).
    """
    Hp, np_, L = a_pad.shape
    assert Hp % 2 == 0
    a4 = a_pad.reshape(Hp // 2, 2, np_, L)               # leading split: free
    acc = None
    for kh in range(3):
        lhs = a4[kh // 2: kh // 2 + ho, kh % 2]           # (ho, NP, L)
        lhs = lhs.reshape(ho * np_, L)                    # inner dim NP=8: free
        part = jnp.dot(lhs, w_ref[kh], preferred_element_type=jnp.float32)
        acc = part if acc is None else acc + part
    return acc


def _fold_w(v, wo, c):
    """(1, 1, wo*c) -> sum over the wo lane groups -> (1, 1, c)."""
    acc = v[:, :, 0:c]
    for i in range(1, wo):
        acc = acc + v[:, :, i * c:(i + 1) * c]
    return acc


def _spread_w(v, wo):
    """(1, 1, c) -> tile wo times along lanes -> (1, 1, wo*c)."""
    return jnp.concatenate([v] * wo, axis=2)


# ------------------------------- the kernel --------------------------------- #

def encoder_kernel(x_ref, wc1_ref, wc2_ref, wc3_ref, wl1_ref, wl2_ref, rows_ref,
                   o_ref, pad1_ref, pad2_ref, pad3_ref):
    f32 = jnp.float32
    n = x_ref.shape[0]                     # real batch (<= NP)
    enc = o_ref.shape[1]

    # ---- stage the NCHW input into the (h, n)-major padded layout -----------
    # pad1: (H0+2, NP, W0); zero once (covers the H padding and the unused
    # batch rows), then drop each image in as a contiguous (28, 28) block.
    pad1_ref[...] = jnp.zeros(pad1_ref.shape, f32)
    for i in range(n):
        pad1_ref[1:1 + H0, i, :] = x_ref[i, 0]

    # ---- Conv1 (1 -> 8, k3 s2 p1) + ReLU ------------------------------------
    h = _conv3x3_s2_rows(pad1_ref[...], wc1_ref, H1)      # (H1*NP, L1)
    h = jnp.maximum(h + rows_ref[0:1, 0:L1], 0.0)

    # ---- Conv2 (8 -> 16, k3 s2 p1) + BatchNorm2d(16, batch stats) + ReLU ----
    pad2_ref[0, :, :] = jnp.zeros((NP, L1), f32)          # zero only the borders
    pad2_ref[H1 + 1, :, :] = jnp.zeros((NP, L1), f32)
    pad2_ref[1:1 + H1, :, :] = h.reshape(H1, NP, L1)
    h = _conv3x3_s2_rows(pad2_ref[...], wc2_ref, H2)      # (H2*NP, L2)
    h = (h + rows_ref[1:2, 0:L2]).reshape(H2, NP, L2)

    cnt = H2 * W2 * n                                     # biased BN statistics
    hb = h[:, 0:n, :]                                     # real batch rows only
    s = jnp.sum(jnp.sum(hb, axis=0, keepdims=True), axis=1, keepdims=True)
    mean = _spread_w(_fold_w(s, W2, C2) * (1.0 / cnt), W2)        # (1, 1, L2)
    d = h - mean
    db = d[:, 0:n, :]
    v = jnp.sum(jnp.sum(db * db, axis=0, keepdims=True), axis=1, keepdims=True)
    var = _spread_w(_fold_w(v, W2, C2) * (1.0 / cnt), W2)         # (1, 1, L2)
    gamma = rows_ref[2:3, 0:L2].reshape(1, 1, L2)
    beta = rows_ref[3:4, 0:L2].reshape(1, 1, L2)
    h = jnp.maximum(d * lax.rsqrt(var + EPS) * gamma + beta, 0.0)  # (H2, NP, L2)

    # ---- Conv3 (16 -> 32, k3 s2 p0) + ReLU ----------------------------------
    # H2=7 is padded to 8 only so the even/odd row split is tile aligned; the
    # padded row is never selected by any tap.
    pad3_ref[H2, :, :] = jnp.zeros((NP, L2), f32)
    pad3_ref[0:H2, :, :] = h
    h = _conv3x3_s2_rows(pad3_ref[...], wc3_ref, H3)      # (H3*NP, L3)
    h = jnp.maximum(h + rows_ref[4:5, 0:L3], 0.0)

    # ---- Flatten + Linear(288 -> 128) + ReLU + Linear(128 -> enc) -----------
    # PyTorch's (c, oh, ow) flatten order is folded into the wl1 blocks, so the
    # flatten is just 3 accumulated (NP, 96) @ (96, 128) MXU dots (one per oh).
    h = h.reshape(H3, NP, L3)
    acc = None
    for oh in range(H3):
        part = jnp.dot(h[oh], wl1_ref[oh], preferred_element_type=f32)
        acc = part if acc is None else acc + part
    acc = jnp.maximum(acc + rows_ref[5:6, 0:NH], 0.0)     # (NP, 128)
    out = jnp.dot(acc, wl2_ref[...], preferred_element_type=f32) + rows_ref[6:7, 0:enc]
    o_ref[...] = out[0:n, :].astype(o_ref.dtype)


# ------------------------------ host wrappers -------------------------------- #

def prepare_params(p):
    """One-time conversion of PyTorch-layout parameters into kernel layouts."""
    f32 = np.float32

    def band(w, w_in, pad):
        """(Cout, Cin, 3, 3) torch conv weight -> (3, W_in*Cin, W_out*Cout)
        band matrices: B[kh, iw*Cin+ci, ow*Cout+co] = w[co, ci, kh, iw-2*ow+pad]."""
        w = np.asarray(w, f32)
        co, ci = w.shape[0], w.shape[1]
        wo = (w_in + 2 * pad - 3) // 2 + 1
        B = np.zeros((3, w_in * ci, wo * co), f32)
        for kh in range(3):
            for ow in range(wo):
                for kw in range(3):
                    iw = 2 * ow - pad + kw
                    if 0 <= iw < w_in:
                        B[kh, iw * ci:(iw + 1) * ci, ow * co:(ow + 1) * co] = \
                            w[:, :, kh, kw].T
        return B

    lw1 = np.asarray(p["lw1"], f32)              # (128, 288), torch (out, in)
    lw2 = np.asarray(p["lw2"], f32)              # (enc, 128)
    enc = lw2.shape[0]
    assert lw1.shape == (NH, C3 * H3 * W3) and lw2.shape[1] == NH

    # Linear-1 blocks matching the conv3 output lane layout (ow, c), one per oh.
    wl1 = lw1.reshape(NH, C3, H3, W3).transpose(2, 3, 1, 0).reshape(H3, W3 * C3, NH)

    # All per-channel rows packed into one (8, 128) operand, pre-tiled over the
    # output-width lane groups so no in-kernel channel broadcast is needed.
    rows = np.zeros((8, 128), f32)
    rows[0, :L1] = np.tile(np.asarray(p["b1"], f32), W1)
    rows[1, :L2] = np.tile(np.asarray(p["b2"], f32), W2)
    rows[2, :L2] = np.tile(np.asarray(p["bn_g"], f32), W2)
    rows[3, :L2] = np.tile(np.asarray(p["bn_b"], f32), W2)
    rows[4, :L3] = np.tile(np.asarray(p["b3"], f32), W3)
    rows[5, :NH] = np.asarray(p["lb1"], f32)
    rows[6, :enc] = np.asarray(p["lb2"], f32)

    return {
        "wc1": jnp.asarray(band(p["w1"], W0, 1)),        # (3, 28, 112)
        "wc2": jnp.asarray(band(p["w2"], W1, 1)),        # (3, 112, 112)
        "wc3": jnp.asarray(band(p["w3"], W2, 0)),        # (3, 112, 96)
        "wl1": jnp.asarray(wl1),                         # (3, 96, 128)
        "wl2": jnp.asarray(lw2.T),                       # (128, enc)
        "rows": jnp.asarray(rows),                       # (8, 128)
    }


@jax.jit
def encoder_forward(x, kp):
    """Pallas-backed forward pass matching the PyTorch Encoder (train mode)."""
    n = x.shape[0]
    assert x.shape[1:] == (1, H0, W0), "kernel is specialized to 1x28x28 inputs"
    assert n <= NP, "single-call kernel handles up to 8 images (BN batch stats)"
    enc = kp["wl2"].shape[1]
    return pl.pallas_call(
        encoder_kernel,
        out_shape=jax.ShapeDtypeStruct((n, enc), jnp.float32),
        scratch_shapes=[
            pltpu.VMEM((H0 + 2, NP, W0), jnp.float32),   # conv1 padded input
            pltpu.VMEM((H1 + 2, NP, L1), jnp.float32),   # conv2 padded input
            pltpu.VMEM((H2 + 1, NP, L2), jnp.float32),   # conv3 input (H 7->8)
        ],
    )(x.astype(jnp.float32), kp["wc1"], kp["wc2"], kp["wc3"],
      kp["wl1"], kp["wl2"], kp["rows"])


# ------------------------------ pure-JAX reference --------------------------- #

def encoder_reference(x, params, eps=1e-5):
    dn = ("NCHW", "OIHW", "NCHW")

    h = lax.conv_general_dilated(x, params["w1"], (2, 2), [(1, 1), (1, 1)],
                                 dimension_numbers=dn)
    h = jnp.maximum(h + params["b1"][None, :, None, None], 0.0)

    h = lax.conv_general_dilated(h, params["w2"], (2, 2), [(1, 1), (1, 1)],
                                 dimension_numbers=dn)
    h = h + params["b2"][None, :, None, None]
    mean = jnp.mean(h, axis=(0, 2, 3), keepdims=True)
    var = jnp.mean((h - mean) ** 2, axis=(0, 2, 3), keepdims=True)
    h = (h - mean) * lax.rsqrt(var + eps)
    h = h * params["bn_g"][None, :, None, None] + params["bn_b"][None, :, None, None]
    h = jnp.maximum(h, 0.0)

    h = lax.conv_general_dilated(h, params["w3"], (2, 2), [(0, 0), (0, 0)],
                                 dimension_numbers=dn)
    h = jnp.maximum(h + params["b3"][None, :, None, None], 0.0)

    h = h.reshape(h.shape[0], -1)
    h = jnp.maximum(h @ params["lw1"].T + params["lb1"], 0.0)
    h = h @ params["lw2"].T + params["lb2"]
    return h


# ------------------------------------ main ----------------------------------- #

if __name__ == "__main__":
    encoded_space_dim = 4
    B = 2

    key = jax.random.PRNGKey(0)
    ks = jax.random.split(key, 16)

    def rand(k, shape, scale=0.1):
        return (scale * jax.random.normal(k, shape)).astype(jnp.float32)

    params = {
        # encoder_cnn (PyTorch layouts)
        "w1": rand(ks[0], (8, 1, 3, 3)),   "b1": rand(ks[1], (8,)),
        "w2": rand(ks[2], (16, 8, 3, 3)),  "b2": rand(ks[3], (16,)),
        "bn_g": (1.0 + 0.1 * jax.random.normal(ks[4], (16,))).astype(jnp.float32),
        "bn_b": rand(ks[5], (16,)),
        "w3": rand(ks[6], (32, 16, 3, 3)), "b3": rand(ks[7], (32,)),
        # encoder_lin (PyTorch Linear layout: (out, in))
        "lw1": rand(ks[8], (128, 3 * 3 * 32)), "lb1": rand(ks[9], (128,)),
        "lw2": rand(ks[10], (encoded_space_dim, 128)),
        "lb2": rand(ks[11], (encoded_space_dim,)),
    }

    # Kernel-layout parameters are prepared ONCE (all weight reshapes, band
    # matrices and bias row packing happen here, never inside the forward).
    kparams = prepare_params(params)

    # MNIST-like input, NCHW (1 channel, 28x28 so the flatten yields 3*3*32).
    x = jax.random.normal(ks[12], (B, 1, 28, 28), dtype=jnp.float32)

    out = jax.block_until_ready(encoder_forward(x, kparams))
    ref = jax.block_until_ready(encoder_reference(x, params))

    np.testing.assert_allclose(np.asarray(out), np.asarray(ref),
                               rtol=1e-3, atol=1e-3)
    assert out.shape == (B, encoded_space_dim)
    print("KERNEL_OK")
</pallas_src>

<mosaic_0001>
module attributes {stable_mosaic.version = 11 : i64} {
  func.func @encoder_kernel(%arg0: memref<2x1x28x28xf32, #tpu.memory_space<vmem>>, %arg1: memref<3x28x112xf32, #tpu.memory_space<vmem>>, %arg2: memref<3x112x112xf32, #tpu.memory_space<vmem>>, %arg3: memref<3x112x96xf32, #tpu.memory_space<vmem>>, %arg4: memref<3x96x128xf32, #tpu.memory_space<vmem>>, %arg5: memref<128x4xf32, #tpu.memory_space<vmem>>, %arg6: memref<8x128xf32, #tpu.memory_space<vmem>>, %arg7: memref<2x4xf32, #tpu.memory_space<vmem>>, %arg8: memref<30x8x28xf32, #tpu.memory_space<vmem>>, %arg9: memref<16x8x112xf32, #tpu.memory_space<vmem>>, %arg10: memref<8x8x112xf32, #tpu.memory_space<vmem>>) attributes {dimension_semantics = [], scalar_prefetch = 0 : i64, scratch_operands = 3 : i64, tpu.core_type = #tpu.core_type<tc>} {
    %cst = arith.constant 0.000000e+00 : f32
    %0 = vector.broadcast %cst : f32 to vector<30x8x28xf32>
    %c0 = arith.constant 0 : index
    %c0_0 = arith.constant 0 : index
    %c0_1 = arith.constant 0 : index
    %1 = vector.load %arg8[%c0, %c0_0, %c0_1] : memref<30x8x28xf32, #tpu.memory_space<vmem>>, vector<30x8x28xf32>
    tpu.vector_store %arg8[%c0, %c0_0, %c0_1], %0 {strides = array<i32>} : memref<30x8x28xf32, #tpu.memory_space<vmem>>, vector<30x8x28xf32>,
    %c0_2 = arith.constant 0 : index
    %c0_3 = arith.constant 0 : index
    %c0_4 = arith.constant 0 : index
    %c0_5 = arith.constant 0 : index
    %2 = vector.load %arg0[%c0_2, %c0_3, %c0_4, %c0_5] : memref<2x1x28x28xf32, #tpu.memory_space<vmem>>, vector<1x1x28x28xf32>
    %3 = vector.shape_cast %2 : vector<1x1x28x28xf32> to vector<28x28xf32>
    %c1 = arith.constant 1 : index
    %c0_6 = arith.constant 0 : index
    %c0_7 = arith.constant 0 : index
    %4 = vector.load %arg8[%c1, %c0_6, %c0_7] : memref<30x8x28xf32, #tpu.memory_space<vmem>>, vector<28x1x28xf32>
    %5 = vector.shape_cast %4 : vector<28x1x28xf32> to vector<28x28xf32>
    %6 = vector.shape_cast %3 : vector<28x28xf32> to vector<28x1x28xf32>
    tpu.vector_store %arg8[%c1, %c0_6, %c0_7], %6 {strides = array<i32>} : memref<30x8x28xf32, #tpu.memory_space<vmem>>, vector<28x1x28xf32>,
    %c1_8 = arith.constant 1 : index
    %c0_9 = arith.constant 0 : index
    %c0_10 = arith.constant 0 : index
    %c0_11 = arith.constant 0 : index
    %7 = vector.load %arg0[%c1_8, %c0_9, %c0_10, %c0_11] : memref<2x1x28x28xf32, #tpu.memory_space<vmem>>, vector<1x1x28x28xf32>
    %8 = vector.shape_cast %7 : vector<1x1x28x28xf32> to vector<28x28xf32>
    %c1_12 = arith.constant 1 : index
    %c1_13 = arith.constant 1 : index
    %c0_14 = arith.constant 0 : index
    %9 = vector.load %arg8[%c1_12, %c1_13, %c0_14] : memref<30x8x28xf32, #tpu.memory_space<vmem>>, vector<28x1x28xf32>
    %10 = vector.shape_cast %9 : vector<28x1x28xf32> to vector<28x28xf32>
    %11 = vector.shape_cast %8 : vector<28x28xf32> to vector<28x1x28xf32>
    tpu.vector_store %arg8[%c1_12, %c1_13, %c0_14], %11 {strides = array<i32>} : memref<30x8x28xf32, #tpu.memory_space<vmem>>, vector<28x1x28xf32>,
    %c0_15 = arith.constant 0 : index
    %c0_16 = arith.constant 0 : index
    %c0_17 = arith.constant 0 : index
    %12 = vector.load %arg8[%c0_15, %c0_16, %c0_17] : memref<30x8x28xf32, #tpu.memory_space<vmem>>, vector<30x8x28xf32>
    %13 = vector.shape_cast %12 : vector<30x8x28xf32> to vector<15x2x8x28xf32>
    %14 = vector.extract_strided_slice %13 {offsets = [0, 0, 0, 0], sizes = [14, 1, 8, 28], strides = [1, 1, 1, 1]} : vector<15x2x8x28xf32> to vector<14x1x8x28xf32>
    %15 = vector.shape_cast %14 : vector<14x1x8x28xf32> to vector<14x8x28xf32>
    %16 = vector.shape_cast %15 : vector<14x8x28xf32> to vector<112x28xf32>
    %c0_18 = arith.constant 0 : index
    %c0_19 = arith.constant 0 : index
    %c0_20 = arith.constant 0 : index
    %17 = vector.load %arg1[%c0_18, %c0_19, %c0_20] : memref<3x28x112xf32, #tpu.memory_space<vmem>>, vector<1x28x112xf32>
    %18 = vector.shape_cast %17 : vector<1x28x112xf32> to vector<28x112xf32>
    %cst_21 = arith.constant dense<0.000000e+00> : vector<112x112xf32>
    %19 = tpu.matmul %16, %18, %cst_21 {dimension_numbers = #tpu.dot_dimension_numbers<[1], [0], [0], [1], [0, 0, 1, 1], [], []>} : vector<112x28xf32>, vector<28x112xf32>, vector<112x112xf32> -> vector<112x112xf32>
    %20 = vector.extract_strided_slice %13 {offsets = [0, 1, 0, 0], sizes = [14, 1, 8, 28], strides = [1, 1, 1, 1]} : vector<15x2x8x28xf32> to vector<14x1x8x28xf32>
    %21 = vector.shape_cast %20 : vector<14x1x8x28xf32> to vector<14x8x28xf32>
    %22 = vector.shape_cast %21 : vector<14x8x28xf32> to vector<112x28xf32>
    %c1_22 = arith.constant 1 : index
    %c0_23 = arith.constant 0 : index
    %c0_24 = arith.constant 0 : index
    %23 = vector.load %arg1[%c1_22, %c0_23, %c0_24] : memref<3x28x112xf32, #tpu.memory_space<vmem>>, vector<1x28x112xf32>
    %24 = vector.shape_cast %23 : vector<1x28x112xf32> to vector<28x112xf32>
    %cst_25 = arith.constant dense<0.000000e+00> : vector<112x112xf32>
    %25 = tpu.matmul %22, %24, %cst_25 {dimension_numbers = #tpu.dot_dimension_numbers<[1], [0], [0], [1], [0, 0, 1, 1], [], []>} : vector<112x28xf32>, vector<28x112xf32>, vector<112x112xf32> -> vector<112x112xf32>
    %26 = arith.addf %19, %25 : vector<112x112xf32>
    %27 = vector.extract_strided_slice %13 {offsets = [1, 0, 0, 0], sizes = [14, 1, 8, 28], strides = [1, 1, 1, 1]} : vector<15x2x8x28xf32> to vector<14x1x8x28xf32>
    %28 = vector.shape_cast %27 : vector<14x1x8x28xf32> to vector<14x8x28xf32>
    %29 = vector.shape_cast %28 : vector<14x8x28xf32> to vector<112x28xf32>
    %c2 = arith.constant 2 : index
    %c0_26 = arith.constant 0 : index
    %c0_27 = arith.constant 0 : index
    %30 = vector.load %arg1[%c2, %c0_26, %c0_27] : memref<3x28x112xf32, #tpu.memory_space<vmem>>, vector<1x28x112xf32>
    %31 = vector.shape_cast %30 : vector<1x28x112xf32> to vector<28x112xf32>
    %cst_28 = arith.constant dense<0.000000e+00> : vector<112x112xf32>
    %32 = tpu.matmul %29, %31, %cst_28 {dimension_numbers = #tpu.dot_dimension_numbers<[1], [0], [0], [1], [0, 0, 1, 1], [], []>} : vector<112x28xf32>, vector<28x112xf32>, vector<112x112xf32> -> vector<112x112xf32>
    %33 = arith.addf %26, %32 : vector<112x112xf32>
    %c0_29 = arith.constant 0 : index
    %c0_30 = arith.constant 0 : index
    %34 = vector.load %arg6[%c0_29, %c0_30] : memref<8x128xf32, #tpu.memory_space<vmem>>, vector<1x112xf32>
    %35 = vector.broadcast %34 : vector<1x112xf32> to vector<112x112xf32>
    %36 = arith.addf %33, %35 : vector<112x112xf32>
    %cst_31 = arith.constant 0.000000e+00 : f32
    %37 = vector.broadcast %cst_31 : f32 to vector<112x112xf32>
    %38 = arith.maximumf %36, %37 : vector<112x112xf32>
    %cst_32 = arith.constant 0.000000e+00 : f32
    %39 = vector.broadcast %cst_32 : f32 to vector<8x112xf32>
    %c0_33 = arith.constant 0 : index
    %c0_34 = arith.constant 0 : index
    %c0_35 = arith.constant 0 : index
    %40 = vector.load %arg9[%c0_33, %c0_34, %c0_35] : memref<16x8x112xf32, #tpu.memory_space<vmem>>, vector<1x8x112xf32>
    %41 = vector.shape_cast %40 : vector<1x8x112xf32> to vector<8x112xf32>
    %42 = vector.shape_cast %39 : vector<8x112xf32> to vector<1x8x112xf32>
    tpu.vector_store %arg9[%c0_33, %c0_34, %c0_35], %42 {strides = array<i32>} : memref<16x8x112xf32, #tpu.memory_space<vmem>>, vector<1x8x112xf32>,
    %cst_36 = arith.constant 0.000000e+00 : f32
    %43 = vector.broadcast %cst_36 : f32 to vector<8x112xf32>
    %c15 = arith.constant 15 : index
    %c0_37 = arith.constant 0 : index
    %c0_38 = arith.constant 0 : index
    %44 = vector.load %arg9[%c15, %c0_37, %c0_38] : memref<16x8x112xf32, #tpu.memory_space<vmem>>, vector<1x8x112xf32>
    %45 = vector.shape_cast %44 : vector<1x8x112xf32> to vector<8x112xf32>
    %46 = vector.shape_cast %43 : vector<8x112xf32> to vector<1x8x112xf32>
    tpu.vector_store %arg9[%c15, %c0_37, %c0_38], %46 {strides = array<i32>} : memref<16x8x112xf32, #tpu.memory_space<vmem>>, vector<1x8x112xf32>,
    %47 = vector.shape_cast %38 : vector<112x112xf32> to vector<14x8x112xf32>
    %c1_39 = arith.constant 1 : index
    %c0_40 = arith.constant 0 : index
    %c0_41 = arith.constant 0 : index
    %48 = vector.load %arg9[%c1_39, %c0_40, %c0_41] : memref<16x8x112xf32, #tpu.memory_space<vmem>>, vector<14x8x112xf32>
    tpu.vector_store %arg9[%c1_39, %c0_40, %c0_41], %47 {strides = array<i32>} : memref<16x8x112xf32, #tpu.memory_space<vmem>>, vector<14x8x112xf32>,
    %c0_42 = arith.constant 0 : index
    %c0_43 = arith.constant 0 : index
    %c0_44 = arith.constant 0 : index
    %49 = vector.load %arg9[%c0_42, %c0_43, %c0_44] : memref<16x8x112xf32, #tpu.memory_space<vmem>>, vector<16x8x112xf32>
    %50 = vector.shape_cast %49 : vector<16x8x112xf32> to vector<8x2x8x112xf32>
    %51 = vector.extract_strided_slice %50 {offsets = [0, 0, 0, 0], sizes = [7, 1, 8, 112], strides = [1, 1, 1, 1]} : vector<8x2x8x112xf32> to vector<7x1x8x112xf32>
    %52 = vector.shape_cast %51 : vector<7x1x8x112xf32> to vector<7x8x112xf32>
    %53 = vector.shape_cast %52 : vector<7x8x112xf32> to vector<56x112xf32>
    %c0_45 = arith.constant 0 : index
    %c0_46 = arith.constant 0 : index
    %c0_47 = arith.constant 0 : index
    %54 = vector.load %arg2[%c0_45, %c0_46, %c0_47] : memref<3x112x112xf32, #tpu.memory_space<vmem>>, vector<1x112x112xf32>
    %55 = vector.shape_cast %54 : vector<1x112x112xf32> to vector<112x112xf32>
    %cst_48 = arith.constant dense<0.000000e+00> : vector<56x112xf32>
    %56 = tpu.matmul %53, %55, %cst_48 {dimension_numbers = #tpu.dot_dimension_numbers<[1], [0], [0], [1], [0, 0, 1, 1], [], []>} : vector<56x112xf32>, vector<112x112xf32>, vector<56x112xf32> -> vector<56x112xf32>
    %57 = vector.extract_strided_slice %50 {offsets = [0, 1, 0, 0], sizes = [7, 1, 8, 112], strides = [1, 1, 1, 1]} : vector<8x2x8x112xf32> to vector<7x1x8x112xf32>
    %58 = vector.shape_cast %57 : vector<7x1x8x112xf32> to vector<7x8x112xf32>
    %59 = vector.shape_cast %58 : vector<7x8x112xf32> to vector<56x112xf32>
    %c1_49 = arith.constant 1 : index
    %c0_50 = arith.constant 0 : index
    %c0_51 = arith.constant 0 : index
    %60 = vector.load %arg2[%c1_49, %c0_50, %c0_51] : memref<3x112x112xf32, #tpu.memory_space<vmem>>, vector<1x112x112xf32>
    %61 = vector.shape_cast %60 : vector<1x112x112xf32> to vector<112x112xf32>
    %cst_52 = arith.constant dense<0.000000e+00> : vector<56x112xf32>
    %62 = tpu.matmul %59, %61, %cst_52 {dimension_numbers = #tpu.dot_dimension_numbers<[1], [0], [0], [1], [0, 0, 1, 1], [], []>} : vector<56x112xf32>, vector<112x112xf32>, vector<56x112xf32> -> vector<56x112xf32>
    %63 = arith.addf %56, %62 : vector<56x112xf32>
    %64 = vector.extract_strided_slice %50 {offsets = [1, 0, 0, 0], sizes = [7, 1, 8, 112], strides = [1, 1, 1, 1]} : vector<8x2x8x112xf32> to vector<7x1x8x112xf32>
    %65 = vector.shape_cast %64 : vector<7x1x8x112xf32> to vector<7x8x112xf32>
    %66 = vector.shape_cast %65 : vector<7x8x112xf32> to vector<56x112xf32>
    %c2_53 = arith.constant 2 : index
    %c0_54 = arith.constant 0 : index
    %c0_55 = arith.constant 0 : index
    %67 = vector.load %arg2[%c2_53, %c0_54, %c0_55] : memref<3x112x112xf32, #tpu.memory_space<vmem>>, vector<1x112x112xf32>
    %68 = vector.shape_cast %67 : vector<1x112x112xf32> to vector<112x112xf32>
    %cst_56 = arith.constant dense<0.000000e+00> : vector<56x112xf32>
    %69 = tpu.matmul %66, %68, %cst_56 {dimension_numbers = #tpu.dot_dimension_numbers<[1], [0], [0], [1], [0, 0, 1, 1], [], []>} : vector<56x112xf32>, vector<112x112xf32>, vector<56x112xf32> -> vector<56x112xf32>
    %70 = arith.addf %63, %69 : vector<56x112xf32>
    %c1_57 = arith.constant 1 : index
    %c0_58 = arith.constant 0 : index
    %71 = vector.load %arg6[%c1_57, %c0_58] : memref<8x128xf32, #tpu.memory_space<vmem>>, vector<1x112xf32>
    %72 = vector.broadcast %71 : vector<1x112xf32> to vector<56x112xf32>
    %73 = arith.addf %70, %72 : vector<56x112xf32>
    %74 = vector.shape_cast %73 : vector<56x112xf32> to vector<7x8x112xf32>
    %75 = vector.extract_strided_slice %74 {offsets = [0, 0, 0], sizes = [7, 2, 112], strides = [1, 1, 1]} : vector<7x8x112xf32> to vector<7x2x112xf32>
    %cst_59 = arith.constant dense<0.000000e+00> : vector<2x112xf32>
    %76 = vector.multi_reduction <add>, %75, %cst_59 [0] : vector<7x2x112xf32> to vector<2x112xf32>
    %77 = vector.shape_cast %76 : vector<2x112xf32> to vector<1x2x112xf32>
    %cst_60 = arith.constant dense<0.000000e+00> : vector<1x112xf32>
    %78 = vector.multi_reduction <add>, %77, %cst_60 [1] : vector<1x2x112xf32> to vector<1x112xf32>
    %79 = vector.shape_cast %78 : vector<1x112xf32> to vector<1x1x112xf32>
    %80 = vector.extract_strided_slice %79 {offsets = [0, 0, 0], sizes = [1, 1, 16], strides = [1, 1, 1]} : vector<1x1x112xf32> to vector<1x1x16xf32>
    %81 = vector.extract_strided_slice %79 {offsets = [0, 0, 16], sizes = [1, 1, 16], strides = [1, 1, 1]} : vector<1x1x112xf32> to vector<1x1x16xf32>
    %82 = arith.addf %80, %81 : vector<1x1x16xf32>
    %83 = vector.extract_strided_slice %79 {offsets = [0, 0, 32], sizes = [1, 1, 16], strides = [1, 1, 1]} : vector<1x1x112xf32> to vector<1x1x16xf32>
    %84 = arith.addf %82, %83 : vector<1x1x16xf32>
    %85 = vector.extract_strided_slice %79 {offsets = [0, 0, 48], sizes = [1, 1, 16], strides = [1, 1, 1]} : vector<1x1x112xf32> to vector<1x1x16xf32>
    %86 = arith.addf %84, %85 : vector<1x1x16xf32>
    %87 = vector.extract_strided_slice %79 {offsets = [0, 0, 64], sizes = [1, 1, 16], strides = [1, 1, 1]} : vector<1x1x112xf32> to vector<1x1x16xf32>
    %88 = arith.addf %86, %87 : vector<1x1x16xf32>
    %89 = vector.extract_strided_slice %79 {offsets = [0, 0, 80], sizes = [1, 1, 16], strides = [1, 1, 1]} : vector<1x1x112xf32> to vector<1x1x16xf32>
    %90 = arith.addf %88, %89 : vector<1x1x16xf32>
    %91 = vector.extract_strided_slice %79 {offsets = [0, 0, 96], sizes = [1, 1, 16], strides = [1, 1, 1]} : vector<1x1x112xf32> to vector<1x1x16xf32>
    %92 = arith.addf %90, %91 : vector<1x1x16xf32>
    %cst_61 = arith.constant 0.0102040814 : f32
    %93 = vector.broadcast %cst_61 : f32 to vector<1x1x16xf32>
    %94 = arith.mulf %92, %93 : vector<1x1x16xf32>
    %95 = tpu.concatenate %94, %94, %94, %94, %94, %94, %94 in 2 : vector<1x1x16xf32>, vector<1x1x16xf32>, vector<1x1x16xf32>, vector<1x1x16xf32>, vector<1x1x16xf32>, vector<1x1x16xf32>, vector<1x1x16xf32> -> vector<1x1x112xf32>
    %96 = vector.broadcast %95 : vector<1x1x112xf32> to vector<7x8x112xf32>
    %97 = arith.subf %74, %96 : vector<7x8x112xf32>
    %98 = vector.extract_strided_slice %97 {offsets = [0, 0, 0], sizes = [7, 2, 112], strides = [1, 1, 1]} : vector<7x8x112xf32> to vector<7x2x112xf32>
    %99 = arith.mulf %98, %98 : vector<7x2x112xf32>
    %cst_62 = arith.constant dense<0.000000e+00> : vector<2x112xf32>
    %100 = vector.multi_reduction <add>, %99, %cst_62 [0] : vector<7x2x112xf32> to vector<2x112xf32>
    %101 = vector.shape_cast %100 : vector<2x112xf32> to vector<1x2x112xf32>
    %cst_63 = arith.constant dense<0.000000e+00> : vector<1x112xf32>
    %102 = vector.multi_reduction <add>, %101, %cst_63 [1] : vector<1x2x112xf32> to vector<1x112xf32>
    %103 = vector.shape_cast %102 : vector<1x112xf32> to vector<1x1x112xf32>
    %104 = vector.extract_strided_slice %103 {offsets = [0, 0, 0], sizes = [1, 1, 16], strides = [1, 1, 1]} : vector<1x1x112xf32> to vector<1x1x16xf32>
    %105 = vector.extract_strided_slice %103 {offsets = [0, 0, 16], sizes = [1, 1, 16], strides = [1, 1, 1]} : vector<1x1x112xf32> to vector<1x1x16xf32>
    %106 = arith.addf %104, %105 : vector<1x1x16xf32>
    %107 = vector.extract_strided_slice %103 {offsets = [0, 0, 32], sizes = [1, 1, 16], strides = [1, 1, 1]} : vector<1x1x112xf32> to vector<1x1x16xf32>
    %108 = arith.addf %106, %107 : vector<1x1x16xf32>
    %109 = vector.extract_strided_slice %103 {offsets = [0, 0, 48], sizes = [1, 1, 16], strides = [1, 1, 1]} : vector<1x1x112xf32> to vector<1x1x16xf32>
    %110 = arith.addf %108, %109 : vector<1x1x16xf32>
    %111 = vector.extract_strided_slice %103 {offsets = [0, 0, 64], sizes = [1, 1, 16], strides = [1, 1, 1]} : vector<1x1x112xf32> to vector<1x1x16xf32>
    %112 = arith.addf %110, %111 : vector<1x1x16xf32>
    %113 = vector.extract_strided_slice %103 {offsets = [0, 0, 80], sizes = [1, 1, 16], strides = [1, 1, 1]} : vector<1x1x112xf32> to vector<1x1x16xf32>
    %114 = arith.addf %112, %113 : vector<1x1x16xf32>
    %115 = vector.extract_strided_slice %103 {offsets = [0, 0, 96], sizes = [1, 1, 16], strides = [1, 1, 1]} : vector<1x1x112xf32> to vector<1x1x16xf32>
    %116 = arith.addf %114, %115 : vector<1x1x16xf32>
    %cst_64 = arith.constant 0.0102040814 : f32
    %117 = vector.broadcast %cst_64 : f32 to vector<1x1x16xf32>
    %118 = arith.mulf %116, %117 : vector<1x1x16xf32>
    %119 = tpu.concatenate %118, %118, %118, %118, %118, %118, %118 in 2 : vector<1x1x16xf32>, vector<1x1x16xf32>, vector<1x1x16xf32>, vector<1x1x16xf32>, vector<1x1x16xf32>, vector<1x1x16xf32>, vector<1x1x16xf32> -> vector<1x1x112xf32>
    %c2_65 = arith.constant 2 : index
    %c0_66 = arith.constant 0 : index
    %120 = vector.load %arg6[%c2_65, %c0_66] : memref<8x128xf32, #tpu.memory_space<vmem>>, vector<1x112xf32>
    %121 = vector.shape_cast %120 : vector<1x112xf32> to vector<1x1x112xf32>
    %c3 = arith.constant 3 : index
    %c0_67 = arith.constant 0 : index
    %122 = vector.load %arg6[%c3, %c0_67] : memref<8x128xf32, #tpu.memory_space<vmem>>, vector<1x112xf32>
    %123 = vector.shape_cast %122 : vector<1x112xf32> to vector<1x1x112xf32>
    %cst_68 = arith.constant 9.99999974E-6 : f32
    %124 = vector.broadcast %cst_68 : f32 to vector<1x1x112xf32>
    %125 = arith.addf %119, %124 : vector<1x1x112xf32>
    %126 = math.rsqrt %125 : vector<1x1x112xf32>
    %127 = vector.broadcast %126 : vector<1x1x112xf32> to vector<7x8x112xf32>
    %128 = arith.mulf %97, %127 : vector<7x8x112xf32>
    %129 = vector.broadcast %121 : vector<1x1x112xf32> to vector<7x8x112xf32>
    %130 = arith.mulf %128, %129 : vector<7x8x112xf32>
    %131 = vector.broadcast %123 : vector<1x1x112xf32> to vector<7x8x112xf32>
    %132 = arith.addf %130, %131 : vector<7x8x112xf32>
    %cst_69 = arith.constant 0.000000e+00 : f32
    %133 = vector.broadcast %cst_69 : f32 to vector<7x8x112xf32>
    %134 = arith.maximumf %132, %133 : vector<7x8x112xf32>
    %cst_70 = arith.constant 0.000000e+00 : f32
    %135 = vector.broadcast %cst_70 : f32 to vector<8x112xf32>
    %c7 = arith.constant 7 : index
    %c0_71 = arith.constant 0 : index
    %c0_72 = arith.constant 0 : index
    %136 = vector.load %arg10[%c7, %c0_71, %c0_72] : memref<8x8x112xf32, #tpu.memory_space<vmem>>, vector<1x8x112xf32>
    %137 = vector.shape_cast %136 : vector<1x8x112xf32> to vector<8x112xf32>
    %138 = vector.shape_cast %135 : vector<8x112xf32> to vector<1x8x112xf32>
    tpu.vector_store %arg10[%c7, %c0_71, %c0_72], %138 {strides = array<i32>} : memref<8x8x112xf32, #tpu.memory_space<vmem>>, vector<1x8x112xf32>,
    %c0_73 = arith.constant 0 : index
    %c0_74 = arith.constant 0 : index
    %c0_75 = arith.constant 0 : index
    %139 = vector.load %arg10[%c0_73, %c0_74, %c0_75] : memref<8x8x112xf32, #tpu.memory_space<vmem>>, vector<7x8x112xf32>
    tpu.vector_store %arg10[%c0_73, %c0_74, %c0_75], %134 {strides = array<i32>} : memref<8x8x112xf32, #tpu.memory_space<vmem>>, vector<7x8x112xf32>,
    %c0_76 = arith.constant 0 : index
    %c0_77 = arith.constant 0 : index
    %c0_78 = arith.constant 0 : index
    %140 = vector.load %arg10[%c0_76, %c0_77, %c0_78] : memref<8x8x112xf32, #tpu.memory_space<vmem>>, vector<8x8x112xf32>
    %141 = vector.shape_cast %140 : vector<8x8x112xf32> to vector<4x2x8x112xf32>
    %142 = vector.extract_strided_slice %141 {offsets = [0, 0, 0, 0], sizes = [3, 1, 8, 112], strides = [1, 1, 1, 1]} : vector<4x2x8x112xf32> to vector<3x1x8x112xf32>
    %143 = vector.shape_cast %142 : vector<3x1x8x112xf32> to vector<3x8x112xf32>
    %144 = vector.shape_cast %143 : vector<3x8x112xf32> to vector<24x112xf32>
    %c0_79 = arith.constant 0 : index
    %c0_80 = arith.constant 0 : index
    %c0_81 = arith.constant 0 : index
    %145 = vector.load %arg3[%c0_79, %c0_80, %c0_81] : memref<3x112x96xf32, #tpu.memory_space<vmem>>, vector<1x112x96xf32>
    %146 = vector.shape_cast %145 : vector<1x112x96xf32> to vector<112x96xf32>
    %cst_82 = arith.constant dense<0.000000e+00> : vector<24x96xf32>
    %147 = tpu.matmul %144, %146, %cst_82 {dimension_numbers = #tpu.dot_dimension_numbers<[1], [0], [0], [1], [0, 0, 1, 1], [], []>} : vector<24x112xf32>, vector<112x96xf32>, vector<24x96xf32> -> vector<24x96xf32>
    %148 = vector.extract_strided_slice %141 {offsets = [0, 1, 0, 0], sizes = [3, 1, 8, 112], strides = [1, 1, 1, 1]} : vector<4x2x8x112xf32> to vector<3x1x8x112xf32>
    %149 = vector.shape_cast %148 : vector<3x1x8x112xf32> to vector<3x8x112xf32>
    %150 = vector.shape_cast %149 : vector<3x8x112xf32> to vector<24x112xf32>
    %c1_83 = arith.constant 1 : index
    %c0_84 = arith.constant 0 : index
    %c0_85 = arith.constant 0 : index
    %151 = vector.load %arg3[%c1_83, %c0_84, %c0_85] : memref<3x112x96xf32, #tpu.memory_space<vmem>>, vector<1x112x96xf32>
    %152 = vector.shape_cast %151 : vector<1x112x96xf32> to vector<112x96xf32>
    %cst_86 = arith.constant dense<0.000000e+00> : vector<24x96xf32>
    %153 = tpu.matmul %150, %152, %cst_86 {dimension_numbers = #tpu.dot_dimension_numbers<[1], [0], [0], [1], [0, 0, 1, 1], [], []>} : vector<24x112xf32>, vector<112x96xf32>, vector<24x96xf32> -> vector<24x96xf32>
    %154 = arith.addf %147, %153 : vector<24x96xf32>
    %155 = vector.extract_strided_slice %141 {offsets = [1, 0, 0, 0], sizes = [3, 1, 8, 112], strides = [1, 1, 1, 1]} : vector<4x2x8x112xf32> to vector<3x1x8x112xf32>
    %156 = vector.shape_cast %155 : vector<3x1x8x112xf32> to vector<3x8x112xf32>
    %157 = vector.shape_cast %156 : vector<3x8x112xf32> to vector<24x112xf32>
    %c2_87 = arith.constant 2 : index
    %c0_88 = arith.constant 0 : index
    %c0_89 = arith.constant 0 : index
    %158 = vector.load %arg3[%c2_87, %c0_88, %c0_89] : memref<3x112x96xf32, #tpu.memory_space<vmem>>, vector<1x112x96xf32>
    %159 = vector.shape_cast %158 : vector<1x112x96xf32> to vector<112x96xf32>
    %cst_90 = arith.constant dense<0.000000e+00> : vector<24x96xf32>
    %160 = tpu.matmul %157, %159, %cst_90 {dimension_numbers = #tpu.dot_dimension_numbers<[1], [0], [0], [1], [0, 0, 1, 1], [], []>} : vector<24x112xf32>, vector<112x96xf32>, vector<24x96xf32> -> vector<24x96xf32>
    %161 = arith.addf %154, %160 : vector<24x96xf32>
    %c4 = arith.constant 4 : index
    %c0_91 = arith.constant 0 : index
    %162 = vector.load %arg6[%c4, %c0_91] : memref<8x128xf32, #tpu.memory_space<vmem>>, vector<1x96xf32>
    %163 = vector.broadcast %162 : vector<1x96xf32> to vector<24x96xf32>
    %164 = arith.addf %161, %163 : vector<24x96xf32>
    %cst_92 = arith.constant 0.000000e+00 : f32
    %165 = vector.broadcast %cst_92 : f32 to vector<24x96xf32>
    %166 = arith.maximumf %164, %165 : vector<24x96xf32>
    %167 = vector.shape_cast %166 : vector<24x96xf32> to vector<3x8x96xf32>
    %168 = vector.extract_strided_slice %167 {offsets = [0, 0, 0], sizes = [1, 8, 96], strides = [1, 1, 1]} : vector<3x8x96xf32> to vector<1x8x96xf32>
    %169 = vector.shape_cast %168 : vector<1x8x96xf32> to vector<8x96xf32>
    %c0_93 = arith.constant 0 : index
    %c0_94 = arith.constant 0 : index
    %c0_95 = arith.constant 0 : index
    %170 = vector.load %arg4[%c0_93, %c0_94, %c0_95] : memref<3x96x128xf32, #tpu.memory_space<vmem>>, vector<1x96x128xf32>
    %171 = vector.shape_cast %170 : vector<1x96x128xf32> to vector<96x128xf32>
    %cst_96 = arith.constant dense<0.000000e+00> : vector<8x128xf32>
    %172 = tpu.matmul %169, %171, %cst_96 {dimension_numbers = #tpu.dot_dimension_numbers<[1], [0], [0], [1], [0, 0, 1, 1], [], []>} : vector<8x96xf32>, vector<96x128xf32>, vector<8x128xf32> -> vector<8x128xf32>
    %173 = vector.extract_strided_slice %167 {offsets = [1, 0, 0], sizes = [1, 8, 96], strides = [1, 1, 1]} : vector<3x8x96xf32> to vector<1x8x96xf32>
    %174 = vector.shape_cast %173 : vector<1x8x96xf32> to vector<8x96xf32>
    %c1_97 = arith.constant 1 : index
    %c0_98 = arith.constant 0 : index
    %c0_99 = arith.constant 0 : index
    %175 = vector.load %arg4[%c1_97, %c0_98, %c0_99] : memref<3x96x128xf32, #tpu.memory_space<vmem>>, vector<1x96x128xf32>
    %176 = vector.shape_cast %175 : vector<1x96x128xf32> to vector<96x128xf32>
    %cst_100 = arith.constant dense<0.000000e+00> : vector<8x128xf32>
    %177 = tpu.matmul %174, %176, %cst_100 {dimension_numbers = #tpu.dot_dimension_numbers<[1], [0], [0], [1], [0, 0, 1, 1], [], []>} : vector<8x96xf32>, vector<96x128xf32>, vector<8x128xf32> -> vector<8x128xf32>
    %178 = arith.addf %172, %177 : vector<8x128xf32>
    %179 = vector.extract_strided_slice %167 {offsets = [2, 0, 0], sizes = [1, 8, 96], strides = [1, 1, 1]} : vector<3x8x96xf32> to vector<1x8x96xf32>
    %180 = vector.shape_cast %179 : vector<1x8x96xf32> to vector<8x96xf32>
    %c2_101 = arith.constant 2 : index
    %c0_102 = arith.constant 0 : index
    %c0_103 = arith.constant 0 : index
    %181 = vector.load %arg4[%c2_101, %c0_102, %c0_103] : memref<3x96x128xf32, #tpu.memory_space<vmem>>, vector<1x96x128xf32>
    %182 = vector.shape_cast %181 : vector<1x96x128xf32> to vector<96x128xf32>
    %cst_104 = arith.constant dense<0.000000e+00> : vector<8x128xf32>
    %183 = tpu.matmul %180, %182, %cst_104 {dimension_numbers = #tpu.dot_dimension_numbers<[1], [0], [0], [1], [0, 0, 1, 1], [], []>} : vector<8x96xf32>, vector<96x128xf32>, vector<8x128xf32> -> vector<8x128xf32>
    %184 = arith.addf %178, %183 : vector<8x128xf32>
    %c5 = arith.constant 5 : index
    %c0_105 = arith.constant 0 : index
    %185 = vector.load %arg6[%c5, %c0_105] : memref<8x128xf32, #tpu.memory_space<vmem>>, vector<1x128xf32>
    %186 = vector.broadcast %185 : vector<1x128xf32> to vector<8x128xf32>
    %187 = arith.addf %184, %186 : vector<8x128xf32>
    %cst_106 = arith.constant 0.000000e+00 : f32
    %188 = vector.broadcast %cst_106 : f32 to vector<8x128xf32>
    %189 = arith.maximumf %187, %188 : vector<8x128xf32>
    %c0_107 = arith.constant 0 : index
    %c0_108 = arith.constant 0 : index
    %190 = vector.load %arg5[%c0_107, %c0_108] : memref<128x4xf32, #tpu.memory_space<vmem>>, vector<128x4xf32>
    %cst_109 = arith.constant dense<0.000000e+00> : vector<8x4xf32>
    %191 = tpu.matmul %189, %190, %cst_109 {dimension_numbers = #tpu.dot_dimension_numbers<[1], [0], [0], [1], [0, 0, 1, 1], [], []>} : vector<8x128xf32>, vector<128x4xf32>, vector<8x4xf32> -> vector<8x4xf32>
    %c6 = arith.constant 6 : index
    %c0_110 = arith.constant 0 : index
    %192 = vector.load %arg6[%c6, %c0_110] : memref<8x128xf32, #tpu.memory_space<vmem>>, vector<1x4xf32>
    %193 = vector.broadcast %192 : vector<1x4xf32> to vector<8x4xf32>
    %194 = arith.addf %191, %193 : vector<8x4xf32>
    %195 = vector.extract_strided_slice %194 {offsets = [0, 0], sizes = [2, 4], strides = [1, 1]} : vector<8x4xf32> to vector<2x4xf32>
    %c0_111 = arith.constant 0 : index
    %c0_112 = arith.constant 0 : index
    %196 = vector.load %arg7[%c0_111, %c0_112] : memref<2x4xf32, #tpu.memory_space<vmem>>, vector<2x4xf32>
    tpu.vector_store %arg7[%c0_111, %c0_112], %195 {strides = array<i32>} : memref<2x4xf32, #tpu.memory_space<vmem>>, vector<2x4xf32>,
    return
  }
}

</mosaic_0001>

<bundles_post_ra>
// kernel: encoder_forward.1
= control target key start
LH: loop header
LB: loop body
LE: loop exit
PB: predicated region body
PF: predicated region fallthrough
CT: control target
= control target key end

     0   :  { %vm611_vm0 = vcmask 1043456   ;;  %vm27_vm1 = vcmask 228352   ;;  %v70_v3 = vlaneseq  ;;  %vm3648_vm2 = vmmov 1   ;;  %s4897_s0 = inlined_call_operand.vmem [shape: f32[2,1,28,28], index: 0, kind: input, shape index: {}]   ;;  %s4898_s1 = inlined_call_operand.vmem [shape: f32[3,28,112], index: 1, kind: input, shape index: {}]   ;;  %s4899_s2 = inlined_call_operand.vmem [shape: f32[3,112,112], index: 2, kind: input, shape index: {}]   ;;  %s4900_s3 = inlined_call_operand.vmem [shape: f32[3,112,96], index: 3, kind: input, shape index: {}]   ;;  %s4901_s4 = inlined_call_operand.vmem [shape: f32[3,96,128], index: 4, kind: input, shape index: {}]   ;;  %s4902_s5 = inlined_call_operand.vmem [shape: f32[128,4], index: 5, kind: input, shape index: {}]   ;;  %s4903_s6 = inlined_call_operand.vmem [shape: f32[8,128], index: 6, kind: input, shape index: {}]   ;;  %s4904_s7 = inlined_call_operand.hbm [shape: f32[2,4], index: 7, kind: output, shape index: {}]  }
   0x1   :  { %v560_v0 = vld [vmem:[%s4898_s1] sm:$0xff]  ;;  %v561_v1 = vld [vmem:[%s4898_s1 + $0x8] sm:$0xff]  ;;  %v562_v2 = vld [vmem:[%s4898_s1 + $0x10] sm:$0xff]  ;;  %v3649_v9 = vmov 0.0   ;;  %v3650_v12 = vmov 1966171168  }
   0x2   :  { %v3357_v4 = vpack.c.bf16 %v561_v1, %v560_v0  ;;  %v563_v5 = vld [vmem:[%s4898_s1 + $0x18] sm:$0xf]  ;;  %vm3713_vm3 = vmpackc.low %vm611_vm0, %vm3648_vm2  ;;  %v2523_v7 = vld [vmem:[%s4898_s1 + $0x40] sm:$0xff]  ;;  %28 = vst.msk [vmem:[#allocation2] sm:$0xff] %vm27_vm1, %v3649_v9  ;;  %v68_v13 = vunpack.c.l.s4 %v3650_v12  ;;  %v3786_v14 = vshrl.u32 %v70_v3, 7  ;;  %vm266_vm4 = vcmask 221184  }
   0x3   :  { %v3720_v8 = vpack.c.bf16 %v563_v5, %v562_v2  ;;  %29 = vst.msk [vmem:[#allocation2 + $0x8] sm:$0xff] %vm27_vm1, %v3649_v9  ;;  %30 = vst.msk [vmem:[#allocation2 + $0x10] sm:$0xff] %vm27_vm1, %v3649_v9  ;;  %v2524_v10 = vld [vmem:[%s4898_s1 + $0x48] sm:$0xff]  ;;  %v58_v11 = vld [vmem:[%s4897_s0] sm:$0xff] }
   0x4   :  { %31 = vst.msk [vmem:[#allocation2 + $0x18] sm:$0xff] %vm27_vm1, %v3649_v9  ;;  %32 = vst.msk [vmem:[#allocation2 + $0x20] sm:$0xff] %vm27_vm1, %v3649_v9  ;;  %v2484_v15 = vld [vmem:[%s4897_s0 + $0x20] sm:$0xff]  ;;  %3358 = vmatprep.subr.bf16.mxu0 %v3357_v4  ;;  %v59_v16 = vld [vmem:[%s4897_s0 + $0x8] sm:$0xff]  ;;  %v69_v19 = vunpack.c.0.s8 %v68_v13  ;;  %v66_v20 = vcombine.high %v58_v11, %v58_v11  ;;  %v3816_v25 = vpack.c.bf16 %v2524_v10, %v2523_v7 }
   0x5   :  { %33 = vst.msk [vmem:[#allocation2 + $0x28] sm:$0xff] %vm27_vm1, %v3649_v9  ;;  %34 = vst.msk [vmem:[#allocation2 + $0x30] sm:$0xff] %vm27_vm1, %v3649_v9  ;;  %v2485_v17 = vld [vmem:[%s4897_s0 + $0x28] sm:$0xff]  ;;  %v2525_v18 = vld [vmem:[%s4898_s1 + $0x50] sm:$0xff]  ;;  %3360 = vmatpush3.bf16.msra.mxu0 %v3357_v4  ;;  %v304_v21 = vcombine.high %v2484_v15, %v2484_v15  ;;  %v115_v26 = vcombine.high %v59_v16, %v59_v16 }
   0x6   :  { %35 = vst.msk [vmem:[#allocation2 + $0x38] sm:$0xff] %vm27_vm1, %v3649_v9  ;;  %36 = vst.msk [vmem:[#allocation2 + $0x40] sm:$0xff] %vm27_vm1, %v3649_v9  ;;  %v2526_v22 = vld [vmem:[%s4898_s1 + $0x58] sm:$0xf]  ;;  %v3806_v23 = vld [vmem:[%s4897_s0 + $0x10] sm:$0xff]  ;;  %3363 = vmatprep.subr.msk.bf16.mxu0 %vm3713_vm3, %v3720_v8  ;;  %v353_v27 = vcombine.high %v2485_v17, %v2485_v17  ;;  %v3828_v31 = vsub.s32 %v69_v19, %v3786_v14 }
   0x7   :  { %37 = vst.msk [vmem:[#allocation2 + $0x48] sm:$0xff] %vm27_vm1, %v3649_v9  ;;  %38 = vst.msk [vmem:[#allocation2 + $0x50] sm:$0xff] %vm27_vm1, %v3649_v9  ;;  %v3811_v24 = vld [vmem:[%s4897_s0 + $0x30] sm:$0xff]  ;;  %v2489_v28 = vld [vmem:[%s4898_s1 + $0x20] sm:$0xff]  ;;  %v3830_v32 = vpack.c.bf16 %v2526_v22, %v2525_v18  ;;  %v164_v33 = vcombine.high %v3806_v23, %v3806_v23 }
   0x8   :  { %39 = vst.msk [vmem:[#allocation2 + $0x58] sm:$0xff] %vm27_vm1, %v3649_v9  ;;  %40 = vst.msk [vmem:[#allocation2 + $0x60] sm:$0xff] %vm27_vm1, %v3649_v9  ;;  %v2490_v29 = vld [vmem:[%s4898_s1 + $0x28] sm:$0xff]  ;;  %v2491_v30 = vld [vmem:[%s4898_s1 + $0x30] sm:$0xff]  ;;  %v402_v37 = vcombine.high %v3811_v24, %v3811_v24  ;;  %v3850_v40 = vrot.slane %v58_v11, %v3828_v31  ;;  %v3853_v41 = vrot.slane %v2484_v15, %v3828_v31 }
   0x9   :  { %41 = vst.msk [vmem:[#allocation2 + $0x68] sm:$0xff] %vm27_vm1, %v3649_v9  ;;  %42 = vst.msk [vmem:[#allocation2 + $0x70] sm:$0xff] %vm27_vm1, %v3649_v9  ;;  %v2492_v34 = vld [vmem:[%s4898_s1 + $0x38] sm:$0xf]  ;;  %v3347_v36 = vpack.c.bf16 %v2490_v29, %v2489_v28  ;;  %3366 = vmatpush3.bf16.msk.msra.mxu0 %vm3713_vm3, %v3720_v8  ;;  %v3856_v42 = vrot.slane %v66_v20, %v3828_v31  ;;  %v3859_v43 = vrot.slane %v304_v21, %v3828_v31  ;;  %v531_v44 = vld [vmem:[#allocation2] sm:$0xff] }
   0xa   :  { %43 = vst.msk [vmem:[#allocation2 + $0x78] sm:$0xff] %vm27_vm1, %v3649_v9  ;;  %44 = vst.msk [vmem:[#allocation2 + $0x80] sm:$0xff] %vm27_vm1, %v3649_v9  ;;  %v3840_v35 = vld.sshfl [vmem:[%s4897_s0 + $0x18] sm:$0x33 pattern:$0x75316420]  ;;  %v3351_v38 = vpack.c.bf16 %v2492_v34, %v2491_v30  ;;  %3368 = vmatprep.subr.bf16.mxu0 %v3816_v25  ;;  %v3863_v45 = vrot.slane %v59_v16, %v3828_v31  ;;  %v3866_v46 = vrot.slane %v2485_v17, %v3828_v31 }
   0xb   :  { %45 = vst.msk [vmem:[#allocation2 + $0x88] sm:$0xff] %vm27_vm1, %v3649_v9  ;;  %46 = vst.msk [vmem:[#allocation2 + $0x90] sm:$0xff] %vm27_vm1, %v3649_v9  ;;  %v220_v39 = vcombine.high %v3840_v35, %v3840_v35  ;;  %v3869_v47 = vrot.slane %v115_v26, %v3828_v31  ;;  %v3872_v48 = vrot.slane %v353_v27, %v3828_v31 }
   0xc   :  { %47 = vst.msk [vmem:[#allocation2 + $0x98] sm:$0xff] %vm27_vm1, %v3649_v9  ;;  %48 = vst.msk [vmem:[#allocation2 + $0xa0] sm:$0xff] %vm27_vm1, %v3649_v9 }
   0xd   :  { %49 = vst.msk [vmem:[#allocation2 + $0xa8] sm:$0xff] %vm27_vm1, %v3649_v9  ;;  %50 = vst.msk [vmem:[#allocation2 + $0xb0] sm:$0xff] %vm27_vm1, %v3649_v9 }
   0xe   :  { %51 = vst.msk [vmem:[#allocation2 + $0xb8] sm:$0xff] %vm27_vm1, %v3649_v9  ;;  %52 = vst.msk [vmem:[#allocation2 + $0xc0] sm:$0xff] %vm27_vm1, %v3649_v9 }
   0xf   :  { %53 = vst.msk [vmem:[#allocation2 + $0xc8] sm:$0xff] %vm27_vm1, %v3649_v9  ;;  %54 = vst.msk [vmem:[#allocation2 + $0xd0] sm:$0xff] %vm27_vm1, %v3649_v9 }
  0x10   :  { %55 = vst.msk [vmem:[#allocation2 + $0xd8] sm:$0xff] %vm27_vm1, %v3649_v9  ;;  %56 = vst.msk [vmem:[#allocation2 + $0xe0] sm:$0xff] %vm27_vm1, %v3649_v9 }
  0x11   :  { %12 = vsyncpa [#allocation6], 0  ;;  %2923 = vmatprep.mubr.msk.f32.mxu0 %vm27_vm1, %v531_v44  ;;  %v81_v49 = vcombine.high %v3850_v40, %v3850_v40  ;;  %v319_v50 = vcombine.high %v3853_v41, %v3853_v41  ;;  %v82_v51 = vcombine.high %v3856_v42, %v3856_v42  ;;  %v320_v52 = vcombine.high %v3859_v43, %v3859_v43  ;;  %v3908_v5 = vld.sshfl [vmem:[%s4897_s0 + $0x38] sm:$0x33 pattern:$0x75316420] }
  0x12   :  { %v130_v53 = vcombine.high %v3863_v45, %v3863_v45  ;;  %v368_v54 = vcombine.high %v3866_v46, %v3866_v46  ;;  %v131_v55 = vcombine.high %v3869_v47, %v3869_v47  ;;  %v369_v56 = vcombine.high %v3872_v48, %v3872_v48  ;;  %3348 = vmatprep.subr.bf16.mxu1 %v3347_v36  ;;  %s3653_s28 = smov 80   ;;  %s3654_s29 = smov 112  }
  0x13   :  { %v103_v57 = vrot.slane %v81_v49, %v3828_v31  ;;  %v341_v58 = vrot.slane %v319_v50, %v3828_v31  ;;  %v110_v59 = vrot.slane %v82_v51, %v3828_v31  ;;  %v348_v60 = vrot.slane %v320_v52, %v3828_v31  ;;  %3350 = vmatpush3.bf16.msra.mxu1 %v3347_v36  ;;  %s3655_s30 = smov 64   ;;  %s3656_s8 = smov 96  }
  0x14   :  { %v152_v61 = vrot.slane %v130_v53, %v3828_v31  ;;  %v390_v62 = vrot.slane %v368_v54, %v3828_v31  ;;  %v159_v63 = vrot.slane %v131_v55, %v3828_v31  ;;  %v397_v0 = vrot.slane %v369_v56, %v3828_v31  ;;  %3353 = vmatprep.subr.msk.bf16.mxu1 %vm3713_vm3, %v3351_v38  ;;  %s3657_s9 = smov 32   ;;  %s3658_s10 = smov 48  }
  0x15   :  { %268 = vst.msk [vmem:[#allocation2 + $0x10] sm:$0x1] %vm266_vm4, %v103_v57  ;;  %504 = vst.msk [vmem:[#allocation2 + $0x11] sm:$0x1] %vm266_vm4, %v341_v58  ;;  %v113_v1 = vcombine.high %v103_v57, %v103_v57  ;;  %v351_v2 = vcombine.high %v341_v58, %v341_v58  ;;  %v114_v3 = vcombine.high %v110_v59, %v110_v59  ;;  %v3651_v21 = vmov 0.0|0.0   ;;  %s3659_s11 = smov 16  }
  0x16   :  { %272 = vst.msk [vmem:[#allocation2 + $0x30] sm:$0x1] %vm266_vm4, %v110_v59  ;;  %508 = vst.msk [vmem:[#allocation2 + $0x31] sm:$0x1] %vm266_vm4, %v348_v60  ;;  %v352_v4 = vcombine.high %v348_v60, %v348_v60  ;;  %v162_v7 = vcombine.high %v152_v61, %v152_v61  ;;  %v400_v8 = vcombine.high %v390_v62, %v390_v62  ;;  %v2543_v60 = vld [vmem:[%s4899_s2 + $0x70] sm:$0xff]  ;;  %vm1123_vm5 = vcmask 916480  }
  0x17   :  { %276 = vst.msk [vmem:[#allocation2 + $0x50] sm:$0x1] %vm266_vm4, %v152_v61  ;;  %512 = vst.msk [vmem:[#allocation2 + $0x51] sm:$0x1] %vm266_vm4, %v390_v62  ;;  %v163_v10 = vcombine.high %v159_v63, %v159_v63  ;;  %v401_v11 = vcombine.high %v397_v0, %v397_v0  ;;  %v3920_v12 = vrot.slane %v3806_v23, %v3828_v31  ;;  %3356 = vmatpush3.bf16.msk.msra.mxu1 %vm3713_vm3, %v3351_v38  ;;  %v2544_v61 = vld [vmem:[%s4899_s2 + $0x78] sm:$0xff]  ;;  %vm3652_vm6 = vmmov 0  }
  0x18   :  { %280 = vst.msk [vmem:[#allocation2 + $0x70] sm:$0x1] %vm266_vm4, %v159_v63  ;;  %516 = vst.msk [vmem:[#allocation2 + $0x71] sm:$0x1] %vm266_vm4, %v397_v0  ;;  %v3924_v13 = vrot.slane %v3811_v24, %v3828_v31  ;;  %v3927_v15 = vrot.slane %v164_v33, %v3828_v31  ;;  %v3930_v16 = vrot.slane %v402_v37, %v3828_v31  ;;  %3377 = vmatprep.subr.bf16.mxu1 %v3651_v21  ;;  %vm1565_vm7 = vcmask 910336  }
  0x19   :  { %270 = vst.msk [vmem:[#allocation2 + $0x20] sm:$0x1] %vm266_vm4, %v113_v1  ;;  %506 = vst.msk [vmem:[#allocation2 + $0x21] sm:$0x1] %vm266_vm4, %v351_v2  ;;  %v3942_v17 = vrot.slane %v220_v39, %v3828_v31  ;;  %v458_v18 = vcombine.high %v3908_v5, %v3908_v5  ;;  %v89_v19 = vrot.slane %v3850_v40, %v3828_v31  ;;  %vm1631_vm8 = vcmask 130048  }
  0x1a   :  { %274 = vst.msk [vmem:[#allocation2 + $0x40] sm:$0x1] %vm266_vm4, %v114_v3  ;;  %510 = vst.msk [vmem:[#allocation2 + $0x41] sm:$0x1] %vm266_vm4, %v352_v4  ;;  %v327_v20 = vrot.slane %v3853_v41, %v3828_v31  ;;  %v179_v22 = vcombine.high %v3920_v12, %v3920_v12  ;;  %v417_v23 = vcombine.high %v3924_v13, %v3924_v13  ;;  %vm1633_vm9 = vcmask 261120  }
  0x1b   :  { %278 = vst.msk [vmem:[#allocation2 + $0x60] sm:$0x1] %vm266_vm4, %v162_v7  ;;  %514 = vst.msk [vmem:[#allocation2 + $0x61] sm:$0x1] %vm266_vm4, %v400_v8  ;;  %v180_v24 = vcombine.high %v3927_v15, %v3927_v15  ;;  %v418_v26 = vcombine.high %v3930_v16, %v3930_v16  ;;  %v3962_v27 = vrot.slane %v458_v18, %v3828_v31  ;;  %v2547_v18 = vld [vmem:[%s4899_s2 + $0x90] sm:$0xff]  ;;  %vm1635_vm10 = vcmask 392192  }
  0x1c   :  { %282 = vst.msk [vmem:[#allocation2 + $0x80] sm:$0x1] %vm266_vm4, %v163_v10  ;;  %518 = vst.msk [vmem:[#allocation2 + $0x81] sm:$0x1] %vm266_vm4, %v401_v11  ;;  %v111_v28 = vcombine.high %v89_v19, %v89_v19  ;;  %v349_v29 = vcombine.high %v327_v20, %v327_v20  ;;  %v96_v30 = vrot.slane %v3856_v42, %v3828_v31  ;;  %v3972_v38 = vld [vmem:[#allocation2 + $0x10] sm:$0xff]  ;;  %vm1637_vm11 = vcmask 523264  }
  0x1d   :  { %292 = vst.msk [vmem:[#allocation2 + $0xd0] sm:$0x1] %vm266_vm4, %v3942_v17  ;;  %267 = vst.msk [vmem:[#allocation2 + $0x8] sm:$0x1] %vm266_vm4, %v89_v19  ;;  %v201_v33 = vrot.slane %v179_v22, %v3828_v31  ;;  %v439_v34 = vrot.slane %v417_v23, %v3828_v31  ;;  %v208_v36 = vrot.slane %v180_v24, %v3828_v31  ;;  %2924 = vmatmul.mubr.msk.f32.vlgmr.msra.gmra.mrb[0].mxu0 %vm27_vm1, %v3972_v38  ;;  %v2548_v22 = vld [vmem:[%s4899_s2 + $0x98] sm:$0xff]  ;;  %vm1639_vm12 = vcmask 654336  }
  0x1e   :  { %503 = vst.msk [vmem:[#allocation2 + $0x9] sm:$0x1] %vm266_vm4, %v327_v20  ;;  %v446_v37 = vrot.slane %v418_v26, %v3828_v31  ;;  %528 = vst.msk [vmem:[#allocation2 + $0xd1] sm:$0x1] %vm266_vm4, %v3962_v27  ;;  %v334_v39 = vrot.slane %v3859_v43, %v3828_v31  ;;  %v112_v40 = vcombine.high %v96_v30, %v96_v30  ;;  %3370 = vmatpush3.bf16.msra.mxu0 %v3816_v25  ;;  %v4044_v2 = vld [vmem:[#allocation2 + $0x50] sm:$0xff]  ;;  %vm1641_vm13 = vcmask 785408  }
  0x1f   :  { %269 = vst.msk [vmem:[#allocation2 + $0x18] sm:$0x1] %vm266_vm4, %v111_v28  ;;  %505 = vst.msk [vmem:[#allocation2 + $0x19] sm:$0x1] %vm266_vm4, %v349_v29  ;;  %v138_v41 = vrot.slane %v3863_v45, %v3828_v31  ;;  %v376_v42 = vrot.slane %v3866_v46, %v3828_v31  ;;  %v211_v44 = vcombine.high %v201_v33, %v201_v33  ;;  %v3994_v46 = vld [vmem:[#allocation2 + $0x30] sm:$0xff]  ;;  %3373 = vmatprep.subr.msk.bf16.mxu0 %vm3713_vm3, %v3830_v32  ;;  %vm2467_vm14 = vcmask 25600  }
  0x20   :  { %271 = vst.msk [vmem:[#allocation2 + $0x28] sm:$0x1] %vm266_vm4, %v96_v30  ;;  %284 = vst.msk [vmem:[#allocation2 + $0x90] sm:$0x1] %vm266_vm4, %v201_v33  ;;  %v449_v49 = vcombine.high %v439_v34, %v439_v34  ;;  %v212_v43 = vcombine.high %v208_v36, %v208_v36  ;;  %v450_v50 = vcombine.high %v446_v37, %v446_v37  ;;  %v3992_v45 = vld [vmem:[#allocation2 + $0x20] sm:$0xff] }
  0x21   :  { %520 = vst.msk [vmem:[#allocation2 + $0x91] sm:$0x1] %vm266_vm4, %v439_v34  ;;  %288 = vst.msk [vmem:[#allocation2 + $0xb0] sm:$0x1] %vm266_vm4, %v208_v36  ;;  %v350_v51 = vcombine.high %v334_v39, %v334_v39  ;;  %v160_v52 = vcombine.high %v138_v41, %v138_v41  ;;  %v398_v53 = vcombine.high %v376_v42, %v376_v42  ;;  %2926 = vmatprep.mubr.msk.f32.mxu0 %vm27_vm1, %v3992_v45  ;;  %v4004_v25 = vld [vmem:[#allocation2 + $0x40] sm:$0xff] }
  0x22   :  { %524 = vst.msk [vmem:[#allocation2 + $0xb1] sm:$0x1] %vm266_vm4, %v446_v37  ;;  %507 = vst.msk [vmem:[#allocation2 + $0x29] sm:$0x1] %vm266_vm4, %v334_v39  ;;  %v145_v54 = vrot.slane %v3869_v47, %v3828_v31  ;;  %v383_v47 = vrot.slane %v3872_v48, %v3828_v31  ;;  %v187_v55 = vrot.slane %v3920_v12, %v3828_v31  ;;  %2927 = vmatmul.mubr.msk.f32.gmra.mrb[2].mxu0 %vm27_vm1, %v3994_v46  ;;  %v4056_v7 = vld [vmem:[#allocation2 + $0x60] sm:$0xff]  ;;  %v2546_v12 = vld [vmem:[%s4899_s2 + $0x88] sm:$0xff] }
  0x23   :  { %273 = vst.msk [vmem:[#allocation2 + $0x38] sm:$0x1] %vm266_vm4, %v112_v40  ;;  %275 = vst.msk [vmem:[#allocation2 + $0x48] sm:$0x1] %vm266_vm4, %v138_v41  ;;  %v425_v56 = vrot.slane %v3924_v13, %v3828_v31  ;;  %v194_v58 = vrot.slane %v3927_v15, %v3828_v31  ;;  %v432_v48 = vrot.slane %v3930_v16, %v3828_v31  ;;  %2929 = vmatprep.mubr.msk.f32.mxu0 %vm27_vm1, %v4004_v25  ;;  %v545_v15 = vld [vmem:[#allocation2 + $0x70] sm:$0xff]  ;;  %v547_v19 = vld [vmem:[#allocation2 + $0x80] sm:$0xff] }
  0x24   :  { %511 = vst.msk [vmem:[#allocation2 + $0x49] sm:$0x1] %vm266_vm4, %v376_v42  ;;  %286 = vst.msk [vmem:[#allocation2 + $0xa0] sm:$0x1] %vm266_vm4, %v211_v44  ;;  %v161_v57 = vcombine.high %v145_v54, %v145_v54  ;;  %v227_v59 = vrot.slane %v3840_v35, %v3828_v31  ;;  %v399_v63 = vcombine.high %v383_v47, %v383_v47  ;;  %3376 = vmatpush3.bf16.msk.msra.mxu0 %vm3713_vm3, %v3830_v32  ;;  %v2549_v44 = vld [vmem:[%s4899_s2 + $0xa0] sm:$0xff] }
  0x25   :  { %522 = vst.msk [vmem:[#allocation2 + $0xa1] sm:$0x1] %vm266_vm4, %v449_v49  ;;  %290 = vst.msk [vmem:[#allocation2 + $0xc0] sm:$0x1] %vm266_vm4, %v212_v43  ;;  %v532_v62 = vld [vmem:[#allocation2 + $0x8] sm:$0xff]  ;;  %v209_v35 = vcombine.high %v187_v55, %v187_v55  ;;  %v447_v0 = vcombine.high %v425_v56, %v425_v56  ;;  %v465_v1 = vrot.slane %v3908_v5, %v3828_v31  ;;  %v2545_v5 = vld [vmem:[%s4899_s2 + $0x80] sm:$0xff]  ;;  %3440 = vmatprep.subr.bf16.mxu0 %v3651_v21 }
  0x26   :  { %526 = vst.msk [vmem:[#allocation2 + $0xc1] sm:$0x1] %vm266_vm4, %v450_v50  ;;  %509 = vst.msk [vmem:[#allocation2 + $0x39] sm:$0x1] %vm266_vm4, %v350_v51  ;;  %v210_v3 = vcombine.high %v194_v58, %v194_v58  ;;  %v448_v4 = vcombine.high %v432_v48, %v432_v48  ;;  %v235_v31 = vcombine.high %v227_v59, %v227_v59  ;;  %2894 = vmatprep.mubr.msk.f32.mxu1 %vm27_vm1, %v532_v62  ;;  %v534_v6 = vld [vmem:[#allocation2 + $0x18] sm:$0xff]  ;;  %v557_v37 = vld [vmem:[#allocation2 + $0xd0] sm:$0xff] }
  0x27   :  { %277 = vst.msk [vmem:[#allocation2 + $0x58] sm:$0x1] %vm266_vm4, %v160_v52  ;;  %513 = vst.msk [vmem:[#allocation2 + $0x59] sm:$0x1] %vm266_vm4, %v398_v53  ;;  %v473_v32 = vcombine.high %v465_v1, %v465_v1  ;;  %v236_v8 = vcombine.high %v3942_v17, %v3942_v17  ;;  %v474_v10 = vcombine.high %v3962_v27, %v3962_v27  ;;  %2895 = vmatmul.mubr.msk.f32.vlgmr.msra.gmra.mrb[0].mxu1 %vm27_vm1, %v534_v6  ;;  %v2550_v49 = vld [vmem:[%s4899_s2 + $0xa8] sm:$0xff]  ;;  %v2551_v50 = vld [vmem:[%s4899_s2 + $0xb0] sm:$0xff] }
  0x28   :  { %279 = vst.msk [vmem:[#allocation2 + $0x68] sm:$0x1] %vm266_vm4, %v145_v54  ;;  %515 = vst.msk [vmem:[#allocation2 + $0x69] sm:$0x1] %vm266_vm4, %v383_v47  ;;  %v3378_v11 = vpack.c.bf16 %v2544_v61, %v2543_v60  ;;  %2930 = vmatmul.mubr.msk.f32.gmra.mrb[4].mxu0 %vm27_vm1, %v4044_v2  ;;  %v3381_v17 = vpack.c.bf16 %v2546_v12, %v2545_v5  ;;  %v549_v24 = vld [vmem:[#allocation2 + $0x90] sm:$0xff]  ;;  %v3384_v27 = vpack.c.bf16 %v2548_v22, %v2547_v18  ;;  %v2553_v51 = vld [vmem:[%s4899_s2 + $0xc0] sm:$0xff] }
  0x29   :  { %283 = vst.msk [vmem:[#allocation2 + $0x88] sm:$0x1] %vm266_vm4, %v187_v55  ;;  %519 = vst.msk [vmem:[#allocation2 + $0x89] sm:$0x1] %vm266_vm4, %v425_v56  ;;  %v536_v13 = vld [vmem:[#allocation2 + $0x28] sm:$0xff]  ;;  %2932 = vmatprep.mubr.msk.f32.mxu0 %vm27_vm1, %v4056_v7  ;;  %v553_v30 = vld [vmem:[#allocation2 + $0xb0] sm:$0xff]  ;;  %v3387_v43 = vpack.c.bf16 %v2550_v49, %v2549_v44 }
  0x2a   :  { %281 = vst.msk [vmem:[#allocation2 + $0x78] sm:$0x1] %vm266_vm4, %v161_v57  ;;  %287 = vst.msk [vmem:[#allocation2 + $0xa8] sm:$0x1] %vm266_vm4, %v194_v58  ;;  %3379 = vmatpush3.bf16.msra.mxu1 %v3378_v11  ;;  %2897 = vmatprep.mubr.msk.f32.mxu1 %vm27_vm1, %v536_v13  ;;  %v2554_v52 = vld [vmem:[%s4899_s2 + $0xc8] sm:$0xff]  ;;  %v2555_v54 = vld [vmem:[%s4899_s2 + $0xd0] sm:$0xff] }
  0x2b   :  { %523 = vst.msk [vmem:[#allocation2 + $0xa9] sm:$0x1] %vm266_vm4, %v432_v48  ;;  %291 = vst.msk [vmem:[#allocation2 + $0xc8] sm:$0x1] %vm266_vm4, %v227_v59  ;;  %v540_v16 = vld [vmem:[#allocation2 + $0x48] sm:$0xff]  ;;  %3380 = vmatprep.subr.bf16.mxu1 %v3651_v21  ;;  %v3393_v53 = vpack.c.bf16 %v2554_v52, %v2553_v51 }
  0x2c   :  { %517 = vst.msk [vmem:[#allocation2 + $0x79] sm:$0x1] %vm266_vm4, %v399_v63  ;;  %285 = vst.msk [vmem:[#allocation2 + $0x98] sm:$0x1] %vm266_vm4, %v209_v35  ;;  %2933 = vmatmul.mubr.msk.f32.gmra.mrb[6].mxu0 %vm27_vm1, %v545_v15  ;;  %v551_v28 = vld [vmem:[#allocation2 + $0xa0] sm:$0xff] }
  0x2d   :  { %521 = vst.msk [vmem:[#allocation2 + $0x99] sm:$0x1] %vm266_vm4, %v447_v0  ;;  %527 = vst.msk [vmem:[#allocation2 + $0xc9] sm:$0x1] %vm266_vm4, %v465_v1  ;;  %v538_v20 = vld [vmem:[#allocation2 + $0x38] sm:$0xff]  ;;  %2935 = vmatprep.mubr.msk.f32.mxu0 %vm27_vm1, %v547_v19  ;;  %v555_v34 = vld [vmem:[#allocation2 + $0xc0] sm:$0xff] }
  0x2e   :  { %289 = vst.msk [vmem:[#allocation2 + $0xb8] sm:$0x1] %vm266_vm4, %v210_v3  ;;  %525 = vst.msk [vmem:[#allocation2 + $0xb9] sm:$0x1] %vm266_vm4, %v448_v4  ;;  %2898 = vmatmul.mubr.msk.f32.gmra.mrb[2].mxu1 %vm27_vm1, %v538_v20  ;;  %v542_v23 = vld [vmem:[#allocation2 + $0x58] sm:$0xff] }
  0x2f   :  { %293 = vst.msk [vmem:[#allocation2 + $0xd8] sm:$0x1] %vm266_vm4, %v235_v31  ;;  %529 = vst.msk [vmem:[#allocation2 + $0xd9] sm:$0x1] %vm266_vm4, %v473_v32  ;;  %2900 = vmatprep.mubr.msk.f32.mxu1 %vm27_vm1, %v540_v16  ;;  %v544_v26 = vld [vmem:[#allocation2 + $0x68] sm:$0xff]  ;;  %3382 = vmatpush3.bf16.msra.mxu1 %v3381_v17 }
  0x30   :  { %294 = vst.msk [vmem:[#allocation2 + $0xe0] sm:$0x1] %vm266_vm4, %v236_v8  ;;  %530 = vst.msk [vmem:[#allocation2 + $0xe1] sm:$0x1] %vm266_vm4, %v474_v10  ;;  %3383 = vmatprep.subr.bf16.mxu1 %v3651_v21  ;;  %2936 = vmatmul.mubr.msk.f32.gmra.mrb[8].mxu0 %vm27_vm1, %v549_v24  ;;  %v548_v33 = vld [vmem:[#allocation2 + $0x88] sm:$0xff] }
  0x31   :  { %2938 = vmatprep.mubr.msk.f32.mxu0 %vm27_vm1, %v551_v28  ;;  %1124 = vst.msk [vmem:[#allocation3] sm:$0xff] %vm1123_vm5, %v3649_v9  ;;  %v4169_v1 = vld [vmem:[%s4903_s6] ss:$0 sm:$0xff] }
  0x32   :  { %2901 = vmatmul.mubr.msk.f32.gmra.mrb[4].mxu1 %vm27_vm1, %v542_v23  ;;  %v552_v39 = vld [vmem:[#allocation2 + $0xa8] sm:$0xff] }
  0x33   :  { %2903 = vmatprep.mubr.msk.f32.mxu1 %vm27_vm1, %v544_v26  ;;  %v546_v29 = vld [vmem:[#allocation2 + $0x78] sm:$0xff]  ;;  %3385 = vmatpush3.bf16.msra.mxu1 %v3384_v27  ;;  %v1157_v26 = vld [vmem:[%s4899_s2] sm:$0xff]  ;;  %v1158_v27 = vld [vmem:[%s4899_s2 + $0x8] sm:$0xff] }
  0x34   :  { %3386 = vmatprep.subr.bf16.mxu1 %v3651_v21  ;;  %2939 = vmatmul.mubr.msk.f32.gmra.mrb[10].mxu0 %vm27_vm1, %v553_v30  ;;  %v550_v36 = vld [vmem:[#allocation2 + $0x98] sm:$0xff]  ;;  %v556_v41 = vld [vmem:[#allocation2 + $0xc8] sm:$0xff] }
  0x35   :  { %2941 = vmatprep.mubr.msk.f32.mxu0 %vm27_vm1, %v555_v34  ;;  %v554_v40 = vld [vmem:[#allocation2 + $0xb8] sm:$0xff] }
  0x36   :  { %2904 = vmatmul.mubr.msk.f32.gmra.mrb[6].mxu1 %vm27_vm1, %v546_v29  ;;  %v558_v42 = vld [vmem:[#allocation2 + $0xd8] sm:$0xff] }
  0x37   :  { %2906 = vmatprep.mubr.msk.f32.mxu1 %vm27_vm1, %v548_v33  ;;  %3388 = vmatpush3.bf16.msra.mxu1 %v3387_v43 }
  0x38   :  { %2942 = vmatmul.mubr.msk.f32.gmra.mrb[12].mxu0 %vm27_vm1, %v557_v37  ;;  %3389 = vmatprep.subr.bf16.mxu1 %v3651_v21 }
  0x39   :  { %2952 = vmatprep.mubr.msk.f32.mxu0 %vm27_vm1, %v3972_v38  ;;  %v559_v38 = vld [vmem:[#allocation2 + $0xe0] sm:$0xff] }
  0x3a   :  { %2907 = vmatmul.mubr.msk.f32.gmra.mrb[8].mxu1 %vm27_vm1, %v550_v36 }
  0x3b   :  { %2909 = vmatprep.mubr.msk.f32.mxu1 %vm27_vm1, %v552_v39 }
  0x3c   :  { %2953 = vmatmul.mubr.msk.f32.vlgmr.msra.gmra.mrb[0].mxu0 %vm27_vm1, %v3992_v45  ;;  %v2552_v45 = vld [vmem:[%s4899_s2 + $0xb8] sm:$0xff] }
  0x3d   :  { %2955 = vmatprep.mubr.msk.f32.mxu0 %vm27_vm1, %v3994_v46  ;;  %v3390_v46 = vpack.c.bf16 %v2552_v45, %v2551_v50 }
  0x3e   :  { %2910 = vmatmul.mubr.msk.f32.gmra.mrb[10].mxu1 %vm27_vm1, %v554_v40 }
  0x3f   :  { %2912 = vmatprep.mubr.msk.f32.mxu1 %vm27_vm1, %v556_v41  ;;  %3391 = vmatpush3.bf16.msra.mxu1 %v3390_v46  ;;  %v1159_v41 = vld [vmem:[%s4899_s2 + $0x10] sm:$0xff] }
  0x40   :  { %2956 = vmatmul.mubr.msk.f32.gmra.mrb[2].mxu0 %vm27_vm1, %v4004_v25  ;;  %3392 = vmatprep.subr.bf16.mxu1 %v3651_v21  ;;  %v2556_v25 = vld [vmem:[%s4899_s2 + $0xd8] sm:$0xff] }
  0x41   :  { %2958 = vmatprep.mubr.msk.f32.mxu0 %vm27_vm1, %v4044_v2  ;;  %v3396_v47 = vpack.c.bf16 %v2556_v25, %v2555_v54  ;;  %v1161_v54 = vld [vmem:[%s4899_s2 + $0x20] sm:$0xff]  ;;  %v1162_v25 = vld [vmem:[%s4899_s2 + $0x28] sm:$0xff] }
  0x42   :  { %2913 = vmatmul.mubr.msk.f32.gmra.mrb[12].mxu1 %vm27_vm1, %v558_v42  ;;  %v1160_v42 = vld [vmem:[%s4899_s2 + $0x18] sm:$0xff] }
  0x43   :  { %3394 = vmatpush3.bf16.msra.mxu1 %v3393_v53  ;;  %3001 = vmatprep.mubr.msk.f32.mxu1 %vm3652_vm6, %v3649_v9  ;;  %v3402_v51 = vpack.c.bf16 %v1160_v42, %v1159_v41  ;;  %v2576_v41 = vld [vmem:[%s4899_s2 + $0x108] sm:$0xff] }
  0x44   :  { %2959 = vmatmul.mubr.msk.f32.gmra.mrb[4].mxu0 %vm27_vm1, %v4056_v7  ;;  %3395 = vmatprep.subr.bf16.mxu1 %v3651_v21 }
  0x45   :  { %2961 = vmatprep.mubr.msk.f32.mxu0 %vm27_vm1, %v545_v15 }
  0x47   :  { %3397 = vmatpush3.bf16.msra.mxu1 %v3396_v47 }
  0x48   :  { %2962 = vmatmul.mubr.msk.f32.gmra.mrb[6].mxu0 %vm27_vm1, %v547_v19  ;;  %3398 = vmatprep.subr.bf16.mxu1 %v3651_v21 }
  0x49   :  { %2964 = vmatprep.mubr.msk.f32.mxu0 %vm27_vm1, %v549_v24 }
  0x4c   :  { %2965 = vmatmul.mubr.msk.f32.gmra.mrb[8].mxu0 %vm27_vm1, %v551_v28 }
  0x4d   :  { %2967 = vmatprep.mubr.msk.f32.mxu0 %vm27_vm1, %v553_v30 }
  0x50   :  { %2968 = vmatmul.mubr.msk.f32.gmra.mrb[10].mxu0 %vm27_vm1, %v555_v34 }
  0x51   :  { %2970 = vmatprep.mubr.msk.f32.mxu0 %vm27_vm1, %v557_v37  ;;  %v3399_v37 = vpack.c.bf16 %v1158_v27, %v1157_v26 }
  0x54   :  { %2971 = vmatmul.mubr.msk.f32.gmra.mrb[12].mxu0 %vm27_vm1, %v559_v38 }
  0x55   :  { %3148 = vmatprep.mubr.msk.f32.mxu0 %vm3652_vm6, %v3649_v9 }
  0xfa   :  { %v2896_v55 = vpop.f32.mrb[0].mxu1 }
  0xfb   :  { %v681_v56 = vpop.f32.mrb[1].mxu1 }
 0x101   :  { %v2899_v57 = vpop.f32.mrb[2].mxu1 }
 0x102   :  { %v691_v58 = vpop.f32.mrb[3].mxu1 }
 0x105   :  { %v2902_v48 = vpop.f32.mrb[4].mxu1 }
 0x106   :  { %v701_v59 = vpop.f32.mrb[5].mxu1 }
 0x109   :  { %v2905_v60 = vpop.f32.mrb[6].mxu1 }
 0x10a   :  { %v711_v61 = vpop.f32.mrb[7].mxu1 }
 0x10d   :  { %v2908_v62 = vpop.f32.mrb[8].mxu1 }
 0x10e   :  { %v721_v63 = vpop.f32.mrb[9].mxu1 }
 0x10f   :  { %v2954_v0 = vpop.f32.mrb[0].mxu0 }
 0x110   :  { %v3581_v3 = vadd.f32 %v2954_v0, %v2896_v55  ;;  %v1007_v4 = vpop.f32.mrb[1].mxu0  ;;  %v1164_v0 = vld [vmem:[%s4899_s2 + $0x38] sm:$0xff] }
 0x111   :  { %v4164_v35 = vpop.f32.mrb[10].mxu1  ;;  %v3582_v31 = vadd.f32 %v1007_v4, %v681_v56 }
 0x112   :  { %v4171_v2 = vpop.f32.mrb[11].mxu1  ;;  %v1096_v5 = vadd.f32 %v3581_v3, %v4169_v1 }
 0x113   :  { %v1095_v6 = vadd.f32 %v3582_v31, %v4169_v1  ;;  %v2957_v32 = vpop.f32.mrb[2].mxu0 }
 0x114   :  { %v1110_v10 = vmax.f32 %v1096_v5, 0.0  ;;  %v3583_v11 = vadd.f32 %v2957_v32, %v2899_v57  ;;  %v1017_v12 = vpop.f32.mrb[3].mxu0 }
 0x115   :  { %v4174_v7 = vpop.f32.mrb[12].mxu1  ;;  %v1109_v13 = vmax.f32 %v1095_v6, 0.0  ;;  %v3584_v15 = vadd.f32 %v1017_v12, %v691_v58  ;;  %v1165_v12 = vld [vmem:[%s4899_s2 + $0x40] sm:$0xff] }
 0x116   :  { %v4177_v8 = vpop.f32.mrb[13].mxu1  ;;  %1129 = vst.msk [vmem:[#allocation3 + $0x10] sm:$0xff] %vm1123_vm5, %v1110_v10  ;;  %v1098_v16 = vadd.f32 %v3583_v11, %v4169_v1 }
 0x117   :  { %1128 = vst.msk [vmem:[#allocation3 + $0x8] sm:$0xff] %vm1123_vm5, %v1109_v13  ;;  %v1097_v17 = vadd.f32 %v3584_v15, %v4169_v1  ;;  %v2960_v18 = vpop.f32.mrb[4].mxu0  ;;  %v1166_v13 = vld [vmem:[%s4899_s2 + $0x48] sm:$0xff] }
 0x118   :  { %v1112_v19 = vmax.f32 %v1098_v16, 0.0  ;;  %v3585_v20 = vadd.f32 %v2960_v18, %v2902_v48  ;;  %v1027_v22 = vpop.f32.mrb[5].mxu0 }
 0x119   :  { %v1111_v23 = vmax.f32 %v1097_v17, 0.0  ;;  %v3586_v24 = vadd.f32 %v1027_v22, %v701_v59  ;;  %v3411_v17 = vpack.c.bf16 %v1166_v13, %v1165_v12 }
 0x11a   :  { %1131 = vst.msk [vmem:[#allocation3 + $0x20] sm:$0xff] %vm1123_vm5, %v1112_v19  ;;  %v1100_v28 = vadd.f32 %v3585_v20, %v4169_v1  ;;  %v1167_v19 = vld [vmem:[%s4899_s2 + $0x50] sm:$0xff]  ;;  %v1168_v20 = vld [vmem:[%s4899_s2 + $0x58] sm:$0xff] }
 0x11b   :  { %1130 = vst.msk [vmem:[#allocation3 + $0x18] sm:$0xff] %vm1123_vm5, %v1111_v23  ;;  %v1099_v29 = vadd.f32 %v3586_v24, %v4169_v1  ;;  %v2963_v30 = vpop.f32.mrb[6].mxu0  ;;  %v3414_v22 = vpack.c.bf16 %v1168_v20, %v1167_v19  ;;  %v1169_v23 = vld [vmem:[%s4899_s2 + $0x60] sm:$0xff]  ;;  %v1170_v24 = vld [vmem:[%s4899_s2 + $0x68] sm:$0xff] }
 0x11c   :  { %v1114_v33 = vmax.f32 %v1100_v28, 0.0  ;;  %v3587_v34 = vadd.f32 %v2963_v30, %v2905_v60  ;;  %v1037_v36 = vpop.f32.mrb[7].mxu0  ;;  %v3405_v60 = vpack.c.bf16 %v1162_v25, %v1161_v54  ;;  %v3417_v27 = vpack.c.bf16 %v1170_v24, %v1169_v23  ;;  %v2571_v28 = vld [vmem:[%s4899_s2 + $0xe0] sm:$0xff]  ;;  %v2582_v54 = vld [vmem:[%s4899_s2 + $0x138] sm:$0xff] }
 0x11d   :  { %v1113_v39 = vmax.f32 %v1099_v29, 0.0  ;;  %v3588_v40 = vadd.f32 %v1037_v36, %v711_v61  ;;  %v2572_v29 = vld [vmem:[%s4899_s2 + $0xe8] sm:$0xff]  ;;  %v2573_v36 = vld [vmem:[%s4899_s2 + $0xf0] sm:$0xff]  ;;  %v1144_v42 = vld [vmem:[#allocation3 + $0x10] sm:$0xff] }
 0x11e   :  { %1133 = vst.msk [vmem:[#allocation3 + $0x30] sm:$0xff] %vm1123_vm5, %v1114_v33  ;;  %v1102_v38 = vadd.f32 %v3587_v34, %v4169_v1  ;;  %v1143_v44 = vld [vmem:[#allocation3 + $0x8] sm:$0xff]  ;;  %v1142_v33 = vld [vmem:[#allocation3] sm:$0xff]  ;;  %v3420_v34 = vpack.c.bf16 %v2572_v29, %v2571_v28 }
 0x11f   :  { %1132 = vst.msk [vmem:[#allocation3 + $0x28] sm:$0xff] %vm1123_vm5, %v1113_v39  ;;  %v1101_v49 = vadd.f32 %v3588_v40, %v4169_v1  ;;  %v2966_v43 = vpop.f32.mrb[8].mxu0  ;;  %3002 = vmatmul.mubr.msk.f32.vlgmr.msra.gmra.mrb[14].mxu1 %vm1123_vm5, %v1143_v44  ;;  %v2575_v40 = vld [vmem:[%s4899_s2 + $0x100] sm:$0xff]  ;;  %v2577_v44 = vld [vmem:[%s4899_s2 + $0x110] sm:$0xff] }
 0x120   :  { %v1116_v50 = vmax.f32 %v1102_v38, 0.0  ;;  %v3589_v45 = vadd.f32 %v2966_v43, %v2908_v62  ;;  %3400 = vmatpush3.bf16.msra.mxu1 %v3399_v37  ;;  %v1047_v46 = vpop.f32.mrb[9].mxu0  ;;  %3004 = vmatprep.mubr.msk.f32.mxu1 %vm3652_vm6, %v3649_v9  ;;  %v2574_v37 = vld [vmem:[%s4899_s2 + $0xf8] sm:$0xff]  ;;  %v3426_v38 = vpack.c.bf16 %v2576_v41, %v2575_v40 }
 0x121   :  { %v1115_v52 = vmax.f32 %v1101_v49, 0.0  ;;  %v3590_v53 = vadd.f32 %v1047_v46, %v721_v63  ;;  %3401 = vmatprep.subr.bf16.mxu1 %v3651_v21  ;;  %v1163_v63 = vld [vmem:[%s4899_s2 + $0x30] sm:$0xff]  ;;  %v3423_v39 = vpack.c.bf16 %v2574_v37, %v2573_v36  ;;  %v2578_v49 = vld [vmem:[%s4899_s2 + $0x118] sm:$0xff]  ;;  %v2580_v46 = vld [vmem:[%s4899_s2 + $0x128] sm:$0xff] }
 0x122   :  { %1135 = vst.msk [vmem:[#allocation3 + $0x40] sm:$0xff] %vm1123_vm5, %v1116_v50  ;;  %v1104_v47 = vadd.f32 %v3589_v45, %v4169_v1  ;;  %v1145_v55 = vld [vmem:[#allocation3 + $0x18] sm:$0xff]  ;;  %v3408_v32 = vpack.c.bf16 %v1164_v0, %v1163_v63  ;;  %v1146_v43 = vld [vmem:[#allocation3 + $0x20] sm:$0xff]  ;;  %v3429_v50 = vpack.c.bf16 %v2578_v49, %v2577_v44  ;;  %v2579_v45 = vld [vmem:[%s4899_s2 + $0x120] sm:$0xff] }
 0x123   :  { %1134 = vst.msk [vmem:[#allocation3 + $0x38] sm:$0xff] %vm1123_vm5, %v1115_v52  ;;  %v1103_v56 = vadd.f32 %v3590_v53, %v4169_v1  ;;  %v2969_v57 = vpop.f32.mrb[10].mxu0  ;;  %3005 = vmatmul.mubr.msk.f32.gmra.mrb[16].mxu1 %vm1123_vm5, %v1145_v55  ;;  %v3432_v52 = vpack.c.bf16 %v2580_v46, %v2579_v45  ;;  %v2581_v53 = vld [vmem:[%s4899_s2 + $0x130] sm:$0xff]  ;;  %v2583_v55 = vld [vmem:[%s4899_s2 + $0x140] sm:$0xff] }
 0x124   :  { %v1118_v58 = vmax.f32 %v1104_v47, 0.0  ;;  %v3591_v48 = vadd.f32 %v2969_v57, %v4164_v35  ;;  %3403 = vmatpush3.bf16.msra.mxu1 %v3402_v51  ;;  %v1057_v59 = vpop.f32.mrb[11].mxu0  ;;  %3007 = vmatprep.mubr.msk.f32.mxu1 %vm3652_vm6, %v3649_v9  ;;  %v3435_v47 = vpack.c.bf16 %v2582_v54, %v2581_v53  ;;  %v2592_v49 = vld [vmem:[%s4903_s6 + $0x1] ss:$0 sm:$0xff] }
 0x125   :  { %v1117_v61 = vmax.f32 %v1103_v56, 0.0  ;;  %v3592_v62 = vadd.f32 %v1057_v59, %v4171_v2  ;;  %3404 = vmatprep.subr.bf16.mxu1 %v3651_v21  ;;  %v1148_v51 = vld [vmem:[#allocation3 + $0x30] sm:$0xff]  ;;  %v2584_v56 = vld [vmem:[%s4899_s2 + $0x148] sm:$0xff] }
 0x126   :  { %1137 = vst.msk [vmem:[#allocation3 + $0x50] sm:$0xff] %vm1123_vm5, %v1118_v58  ;;  %v1106_v35 = vadd.f32 %v3591_v48, %v4169_v1  ;;  %v1147_v3 = vld [vmem:[#allocation3 + $0x28] sm:$0xff]  ;;  %v3438_v58 = vpack.c.bf16 %v2584_v56, %v2583_v55 }
 0x127   :  { %1136 = vst.msk [vmem:[#allocation3 + $0x48] sm:$0xff] %vm1123_vm5, %v1117_v61  ;;  %v1105_v4 = vadd.f32 %v3592_v62, %v4169_v1  ;;  %v2972_v2 = vpop.f32.mrb[12].mxu0  ;;  %3008 = vmatmul.mubr.msk.f32.gmra.mrb[18].mxu1 %vm1123_vm5, %v1147_v3 }
 0x128   :  { %v1120_v31 = vmax.f32 %v1106_v35, 0.0  ;;  %v3593_v5 = vadd.f32 %v2972_v2, %v4174_v7  ;;  %3406 = vmatpush3.bf16.msra.mxu1 %v3405_v60  ;;  %v1067_v6 = vpop.f32.mrb[13].mxu0  ;;  %3010 = vmatprep.mubr.msk.f32.mxu1 %vm3652_vm6, %v3649_v9 }
 0x129   :  { %v1119_v10 = vmax.f32 %v1105_v4, 0.0  ;;  %v3594_v11 = vadd.f32 %v1067_v6, %v4177_v8  ;;  %3407 = vmatprep.subr.bf16.mxu1 %v3651_v21  ;;  %v1150_v25 = vld [vmem:[#allocation3 + $0x40] sm:$0xff] }
 0x12a   :  { %1139 = vst.msk [vmem:[#allocation3 + $0x60] sm:$0xff] %vm1123_vm5, %v1120_v31  ;;  %v1108_v7 = vadd.f32 %v3593_v5, %v4169_v1  ;;  %v1149_v15 = vld [vmem:[#allocation3 + $0x38] sm:$0xff] }
 0x12b   :  { %1138 = vst.msk [vmem:[#allocation3 + $0x58] sm:$0xff] %vm1123_vm5, %v1119_v10  ;;  %v1107_v16 = vadd.f32 %v3594_v11, %v4169_v1  ;;  %3011 = vmatmul.mubr.msk.f32.gmra.mrb[20].mxu1 %vm1123_vm5, %v1149_v15 }
 0x12c   :  { %v1122_v8 = vmax.f32 %v1108_v7, 0.0  ;;  %3409 = vmatpush3.bf16.msra.mxu1 %v3408_v32  ;;  %3013 = vmatprep.mubr.msk.f32.mxu1 %vm3652_vm6, %v3649_v9 }
 0x12d   :  { %v1121_v18 = vmax.f32 %v1107_v16, 0.0  ;;  %3410 = vmatprep.subr.bf16.mxu1 %v3651_v21  ;;  %v1152_v57 = vld [vmem:[#allocation3 + $0x50] sm:$0xff] }
 0x12e   :  { %1141 = vst.msk [vmem:[#allocation3 + $0x70] sm:$0xff] %vm1123_vm5, %v1122_v8  ;;  %v1151_v1 = vld [vmem:[#allocation3 + $0x48] sm:$0xff] }
 0x12f   :  { %1140 = vst.msk [vmem:[#allocation3 + $0x68] sm:$0xff] %vm1123_vm5, %v1121_v18  ;;  %3014 = vmatmul.mubr.msk.f32.gmra.mrb[22].mxu1 %vm1123_vm5, %v1151_v1 }
 0x130   :  { %3412 = vmatpush3.bf16.msra.mxu1 %v3411_v17  ;;  %3016 = vmatprep.mubr.msk.f32.mxu1 %vm3652_vm6, %v3649_v9 }
 0x131   :  { %3413 = vmatprep.subr.bf16.mxu1 %v3651_v21  ;;  %v1154_v48 = vld [vmem:[#allocation3 + $0x60] sm:$0xff] }
 0x132   :  { %v1153_v26 = vld [vmem:[#allocation3 + $0x58] sm:$0xff] }
 0x133   :  { %3017 = vmatmul.mubr.msk.f32.gmra.mrb[24].mxu1 %vm1123_vm5, %v1153_v26 }
 0x134   :  { %3415 = vmatpush3.bf16.msra.mxu1 %v3414_v22  ;;  %3019 = vmatprep.mubr.msk.f32.mxu1 %vm3652_vm6, %v3649_v9 }
 0x135   :  { %3416 = vmatprep.subr.bf16.mxu1 %v3651_v21  ;;  %v1156_v59 = vld [vmem:[#allocation3 + $0x70] sm:$0xff] }
 0x136   :  { %v1155_v30 = vld [vmem:[#allocation3 + $0x68] sm:$0xff] }
 0x137   :  { %3020 = vmatmul.mubr.msk.f32.gmra.mrb[26].mxu1 %vm1123_vm5, %v1155_v30 }
 0x138   :  { %3418 = vmatpush3.bf16.msra.mxu1 %v3417_v27  ;;  %3050 = vmatprep.mubr.msk.f32.mxu1 %vm3652_vm6, %v3649_v9 }
 0x139   :  { %3419 = vmatprep.subr.bf16.mxu1 %v3651_v21 }
 0x13b   :  { %3051 = vmatmul.mubr.msk.f32.vlgmr.msra.gmra.mrb[28].mxu1 %vm1123_vm5, %v1142_v33 }
 0x13c   :  { %3421 = vmatpush3.bf16.msra.mxu1 %v3420_v34  ;;  %3053 = vmatprep.mubr.msk.f32.mxu1 %vm3652_vm6, %v3649_v9 }
 0x13d   :  { %3422 = vmatprep.subr.bf16.mxu1 %v3651_v21 }
 0x13f   :  { %3054 = vmatmul.mubr.msk.f32.gmra.mrb[30].mxu1 %vm1123_vm5, %v1144_v42 }
 0x140   :  { %3424 = vmatpush3.bf16.msra.mxu1 %v3423_v39  ;;  %3056 = vmatprep.mubr.msk.f32.mxu1 %vm3652_vm6, %v3649_v9 }
 0x141   :  { %3425 = vmatprep.subr.bf16.mxu1 %v3651_v21 }
 0x143   :  { %3057 = vmatmul.mubr.msk.f32.gmra.mrb[32].mxu1 %vm1123_vm5, %v1146_v43 }
 0x144   :  { %3427 = vmatpush3.bf16.msra.mxu1 %v3426_v38  ;;  %3059 = vmatprep.mubr.msk.f32.mxu1 %vm3652_vm6, %v3649_v9 }
 0x145   :  { %3428 = vmatprep.subr.bf16.mxu1 %v3651_v21 }
 0x147   :  { %3060 = vmatmul.mubr.msk.f32.gmra.mrb[34].mxu1 %vm1123_vm5, %v1148_v51 }
 0x148   :  { %3430 = vmatpush3.bf16.msra.mxu1 %v3429_v50  ;;  %3062 = vmatprep.mubr.msk.f32.mxu1 %vm3652_vm6, %v3649_v9 }
 0x149   :  { %3431 = vmatprep.subr.bf16.mxu1 %v3651_v21 }
 0x14b   :  { %3063 = vmatmul.mubr.msk.f32.gmra.mrb[36].mxu1 %vm1123_vm5, %v1150_v25 }
 0x14c   :  { %3433 = vmatpush3.bf16.msra.mxu1 %v3432_v52  ;;  %3065 = vmatprep.mubr.msk.f32.mxu1 %vm3652_vm6, %v3649_v9 }
 0x14d   :  { %3434 = vmatprep.subr.bf16.mxu1 %v3651_v21 }
 0x14f   :  { %3066 = vmatmul.mubr.msk.f32.gmra.mrb[38].mxu1 %vm1123_vm5, %v1152_v57 }
 0x150   :  { %3436 = vmatpush3.bf16.msra.mxu1 %v3435_v47  ;;  %3068 = vmatprep.mubr.msk.f32.mxu1 %vm3652_vm6, %v3649_v9 }
 0x151   :  { %3437 = vmatprep.subr.bf16.mxu1 %v3651_v21 }
 0x153   :  { %3069 = vmatmul.mubr.msk.f32.gmra.mrb[40].mxu1 %vm1123_vm5, %v1154_v48 }
 0x154   :  { %3439 = vmatpush3.bf16.msra.mxu1 %v3438_v58  ;;  %3099 = vmatprep.mubr.msk.f32.mxu1 %vm3652_vm6, %v3649_v9 }
 0x155   :  { %3461 = vmatprep.subr.bf16.mxu1 %v3651_v21 }
 0x157   :  { %3100 = vmatmul.mubr.msk.f32.vlgmr.msra.gmra.mrb[42].mxu1 %vm1123_vm5, %v1144_v42 }
 0x158   :  { %3102 = vmatprep.mubr.msk.f32.mxu1 %vm3652_vm6, %v3649_v9 }
 0x15b   :  { %3103 = vmatmul.mubr.msk.f32.gmra.mrb[44].mxu1 %vm1123_vm5, %v1146_v43 }
 0x15c   :  { %3105 = vmatprep.mubr.msk.f32.mxu1 %vm3652_vm6, %v3649_v9 }
 0x15f   :  { %3106 = vmatmul.mubr.msk.f32.gmra.mrb[46].mxu1 %vm1123_vm5, %v1148_v51 }
 0x160   :  { %3108 = vmatprep.mubr.msk.f32.mxu1 %vm3652_vm6, %v3649_v9 }
 0x163   :  { %3109 = vmatmul.mubr.msk.f32.gmra.mrb[48].mxu1 %vm1123_vm5, %v1150_v25 }
 0x164   :  { %3111 = vmatprep.mubr.msk.f32.mxu1 %vm3652_vm6, %v3649_v9 }
 0x167   :  { %3112 = vmatmul.mubr.msk.f32.gmra.mrb[50].mxu1 %vm1123_vm5, %v1152_v57 }
 0x168   :  { %3114 = vmatprep.mubr.msk.f32.mxu1 %vm3652_vm6, %v3649_v9 }
 0x16b   :  { %3115 = vmatmul.mubr.msk.f32.gmra.mrb[52].mxu1 %vm1123_vm5, %v1154_v48 }
 0x16c   :  { %3117 = vmatprep.mubr.msk.f32.mxu1 %vm3652_vm6, %v3649_v9 }
 0x16f   :  { %3118 = vmatmul.mubr.msk.f32.gmra.mrb[54].mxu1 %vm1123_vm5, %v1156_v59 }
 0x170   :  { %3185 = vmatprep.mubr.msk.f32.mxu1 %vm3652_vm6, %v3649_v9 }
 0x1f2   :  { %v1273_v60 = vpop.f32.mrb[14].mxu1 }
 0x1f3   :  { %v3003_v61 = vpop.f32.mrb[15].mxu1 }
 0x1f6   :  { %v1278_v62 = vpop.f32.mrb[16].mxu1 }
 0x1f7   :  { %v3006_v63 = vpop.f32.mrb[17].mxu1 }
 0x1fa   :  { %v1283_v0 = vpop.f32.mrb[18].mxu1 }
 0x1fb   :  { %v3009_v35 = vpop.f32.mrb[19].mxu1 }
 0x1fe   :  { %v1288_v3 = vpop.f32.mrb[20].mxu1 }
 0x1ff   :  { %v3012_v4 = vpop.f32.mrb[21].mxu1 }
 0x202   :  { %v1293_v2 = vpop.f32.mrb[22].mxu1 }
 0x203   :  { %v3015_v31 = vpop.f32.mrb[23].mxu1 }
 0x206   :  { %v1298_v5 = vpop.f32.mrb[24].mxu1 }
 0x207   :  { %v3018_v6 = vpop.f32.mrb[25].mxu1 }
 0x20a   :  { %v1303_v32 = vpop.f32.mrb[26].mxu1 }
 0x20b   :  { %v3021_v10 = vpop.f32.mrb[27].mxu1 }
 0x20e   :  { %v1394_v11 = vpop.f32.mrb[28].mxu1 }
 0x20f   :  { %v1395_v12 = vadd.f32 %v1394_v11, %v1273_v60  ;;  %v3052_v13 = vpop.f32.mrb[29].mxu1 }
 0x212   :  { %v1399_v7 = vpop.f32.mrb[30].mxu1 }
 0x213   :  { %v1400_v15 = vadd.f32 %v1399_v7, %v1278_v62  ;;  %v3055_v16 = vpop.f32.mrb[31].mxu1 }
 0x216   :  { %v1404_v8 = vpop.f32.mrb[32].mxu1 }
 0x217   :  { %v1405_v17 = vadd.f32 %v1404_v8, %v1283_v0  ;;  %v3058_v18 = vpop.f32.mrb[33].mxu1 }
 0x21a   :  { %v1409_v19 = vpop.f32.mrb[34].mxu1 }
 0x21b   :  { %v1410_v20 = vadd.f32 %v1409_v19, %v1288_v3  ;;  %v3061_v1 = vpop.f32.mrb[35].mxu1 }
 0x21e   :  { %v1414_v22 = vpop.f32.mrb[36].mxu1 }
 0x21f   :  { %v1415_v23 = vadd.f32 %v1414_v22, %v1293_v2  ;;  %v3064_v24 = vpop.f32.mrb[37].mxu1 }
 0x222   :  { %v1419_v26 = vpop.f32.mrb[38].mxu1 }
 0x223   :  { %v1420_v27 = vadd.f32 %v1419_v26, %v1298_v5  ;;  %v3067_v28 = vpop.f32.mrb[39].mxu1 }
 0x226   :  { %v1424_v29 = vpop.f32.mrb[40].mxu1 }
 0x227   :  { %v1425_v30 = vadd.f32 %v1424_v29, %v1303_v32  ;;  %v3070_v33 = vpop.f32.mrb[41].mxu1 }
 0x22a   :  { %v1512_v34 = vpop.f32.mrb[42].mxu1 }
 0x22b   :  { %v1546_v36 = vadd.f32 %v1512_v34, %v1395_v12  ;;  %v3101_v37 = vpop.f32.mrb[43].mxu1 }
 0x22d   :  { %v4375_v51 = vadd.f32 %v2592_v49, %v1546_v36 }
 0x22e   :  { %v1517_v39 = vpop.f32.mrb[44].mxu1 }
 0x22f   :  { %v1547_v40 = vadd.f32 %v1517_v39, %v1400_v15  ;;  %v3104_v41 = vpop.f32.mrb[45].mxu1  ;;  %v1566_v56 = vsel %vm1565_vm7, %v4375_v51, 0.0 }
 0x231   :  { %v4373_v50 = vadd.f32 %v2592_v49, %v1547_v40 }
 0x232   :  { %v1522_v42 = vpop.f32.mrb[46].mxu1 }
 0x233   :  { %v1548_v38 = vadd.f32 %v1522_v42, %v1405_v17  ;;  %v3107_v44 = vpop.f32.mrb[47].mxu1  ;;  %v1567_v54 = vsel %vm1565_vm7, %v4373_v50, 0.0 }
 0x234   :  { %v1568_v48 = vadd.f32 %v1567_v54, %v1566_v56  ;;  %v1645_v44 = vsub.s32 0, %v3786_v14  ;;  %v2594_v14 = vld [vmem:[%s4903_s6 + $0x3] ss:$0 sm:$0xff] }
 0x235   :  { %v4377_v52 = vadd.f32 %v2592_v49, %v1548_v38 }
 0x236   :  { %v1527_v43 = vpop.f32.mrb[48].mxu1 }
 0x237   :  { %v1549_v45 = vadd.f32 %v1527_v43, %v1410_v20  ;;  %v3110_v46 = vpop.f32.mrb[49].mxu1  ;;  %v1569_v57 = vsel %vm1565_vm7, %v4377_v52, 0.0 }
 0x238   :  { %v1570_v63 = vadd.f32 %v1569_v57, %v1568_v48 }
 0x239   :  { %v4381_v25 = vadd.f32 %v2592_v49, %v1549_v45 }
 0x23a   :  { %v1532_v53 = vpop.f32.mrb[50].mxu1 }
 0x23b   :  { %v1550_v47 = vadd.f32 %v1532_v53, %v1415_v23  ;;  %v3113_v55 = vpop.f32.mrb[51].mxu1  ;;  %v1571_v60 = vsel %vm1565_vm7, %v4381_v25, 0.0 }
 0x23c   :  { %v1572_v3 = vadd.f32 %v1571_v60, %v1570_v63 }
 0x23d   :  { %v4387_v58 = vadd.f32 %v2592_v49, %v1550_v47 }
 0x23e   :  { %v1537_v59 = vpop.f32.mrb[52].mxu1 }
 0x23f   :  { %v1551_v61 = vadd.f32 %v1537_v59, %v1420_v27  ;;  %v3116_v62 = vpop.f32.mrb[53].mxu1  ;;  %v1573_v0 = vsel %vm1565_vm7, %v4387_v58, 0.0 }
 0x240   :  { %v1574_v6 = vadd.f32 %v1573_v0, %v1572_v3 }
 0x241   :  { %v4393_v35 = vadd.f32 %v2592_v49, %v1551_v61 }
 0x242   :  { %v1542_v4 = vpop.f32.mrb[54].mxu1 }
 0x243   :  { %v1575_v2 = vsel %vm1565_vm7, %v4393_v35, 0.0  ;;  %v1552_v31 = vadd.f32 %v1542_v4, %v1425_v30  ;;  %v3119_v5 = vpop.f32.mrb[55].mxu1 }
 0x244   :  { %v1576_v10 = vadd.f32 %v1575_v2, %v1574_v6 }
 0x245   :  { %v4397_v32 = vadd.f32 %v2592_v49, %v1552_v31 }
 0x247   :  { %v1577_v11 = vsel %vm1565_vm7, %v4397_v32, 0.0 }
 0x248   :  { %v1578_v12 = vadd.f32 %v1577_v11, %v1576_v10 }
 0x24a   :  { %v1579_v13 = vsel %vm1565_vm7, %v1578_v12, 0.0 }
 0x24b   :  { %v1580_v7 = vrot.slane %v1579_v13, 4 }
 0x24d   :  { %v1581_v15 = vadd.f32 %v1580_v7, %v1579_v13 }
 0x24f   :  { %v1582_v16 = vrot.slane %v1581_v15, 2 }
 0x251   :  { %v1583_v8 = vadd.f32 %v1582_v16, %v1581_v15 }
 0x253   :  { %v1584_v17 = vrot.slane %v1583_v8, 1 }
 0x255   :  { %v1585_v18 = vadd.f32 %v1584_v17, %v1583_v8 }
 0x257   :  { %1595 = vrot.lane.b32.xlu1 %v1585_v18, %s3653_s28  ;;  %1587 = vrot.lane.b32.xlu0 %v1585_v18, %s3654_s29 }
 0x25b   :  { %1599 = vrot.lane.b32.xlu1 %v1585_v18, %s3655_s30  ;;  %1591 = vrot.lane.b32.xlu0 %v1585_v18, %s3656_s8 }
 0x25f   :  { %1607 = vrot.lane.b32.xlu1 %v1585_v18, %s3657_s9  ;;  %1603 = vrot.lane.b32.xlu0 %v1585_v18, %s3658_s10 }
 0x2c9   :  { %v1596_v19 = vpop.permute.xlu1 %1595  ;;  %v1588_v20 = vpop.permute.xlu0 %1587 }
 0x2ca   :  { %v1590_v1 = vadd.f32 %v1588_v20, %v1585_v18 }
 0x2cd   :  { %v1592_v22 = vpop.permute.xlu0 %1591  ;;  %v1600_v24 = vpop.permute.xlu1 %1599 }
 0x2ce   :  { %v1594_v23 = vadd.f32 %v1592_v22, %v1590_v1 }
 0x2d0   :  { %v1598_v26 = vadd.f32 %v1596_v19, %v1594_v23 }
 0x2d1   :  { %v1604_v28 = vpop.permute.xlu0 %1603  ;;  %v1608_v30 = vpop.permute.xlu1 %1607 }
 0x2d2   :  { %v1602_v27 = vadd.f32 %v1600_v24, %v1598_v26 }
 0x2d4   :  { %v1606_v29 = vadd.f32 %v1604_v28, %v1602_v27 }
 0x2d6   :  { %v1610_v33 = vadd.f32 %v1608_v30, %v1606_v29 }
 0x2d8   :  { %v1611_v34 = vmul.f32 0.010204081, %v1610_v33 }
 0x2da   :  { %1616 = vrot.lane.b32.xlu1 %v1611_v34, %s3657_s9  ;;  %1613 = vrot.lane.b32.xlu0 %v1611_v34, %s3659_s11 }
 0x2de   :  { %1622 = vrot.lane.b32.xlu1 %v1611_v34, %s3655_s30  ;;  %1619 = vrot.lane.b32.xlu0 %v1611_v34, %s3658_s10 }
 0x2e2   :  { %1628 = vrot.lane.b32.xlu1 %v1611_v34, %s3656_s8  ;;  %1625 = vrot.lane.b32.xlu0 %v1611_v34, %s3653_s28 }
 0x34c   :  { %v1617_v36 = vpop.permute.xlu1 %1616  ;;  %v1614_v37 = vpop.permute.xlu0 %1613 }
 0x34d   :  { %v1632_v39 = vsel %vm1631_vm8, %v1611_v34, %v1614_v37  ;;  %v2596_v37 = vld [vmem:[%s4900_s3 + $0x78] sm:$0xff] }
 0x34e   :  { %v1634_v41 = vsel %vm1633_vm9, %v1632_v39, %v1617_v36  ;;  %v2595_v36 = vld [vmem:[%s4900_s3 + $0x70] sm:$0xff] }
 0x34f   :  { %v3441_v39 = vpack.c.bf16 %v2596_v37, %v2595_v36 }
 0x350   :  { %v1623_v40 = vpop.permute.xlu1 %1622  ;;  %v1620_v42 = vpop.permute.xlu0 %1619 }
 0x351   :  { %v1636_v38 = vsel %vm1635_vm10, %v1634_v41, %v1620_v42  ;;  %v1793_v41 = vld [vmem:[%s4900_s3 + $0x8] sm:$0xff]  ;;  %3442 = vmatpush3.bf16.msra.mxu0 %v3441_v39 }
 0x352   :  { %v1638_v43 = vsel %vm1637_vm11, %v1636_v38, %v1623_v40  ;;  %v1792_v40 = vld [vmem:[%s4900_s3] sm:$0xff]  ;;  %3443 = vmatprep.subr.bf16.mxu0 %v3651_v21 }
 0x353   :  { %v3462_v42 = vpack.c.bf16 %v1793_v41, %v1792_v40  ;;  %v2597_v38 = vld [vmem:[%s4900_s3 + $0x80] sm:$0xff] }
 0x354   :  { %v1629_v49 = vpop.permute.xlu1 %1628  ;;  %v1626_v45 = vpop.permute.xlu0 %1625  ;;  %v2593_v41 = vld [vmem:[%s4903_s6 + $0x2] ss:$0 sm:$0xff] }
 0x355   :  { %v1640_v46 = vsel %vm1639_vm12, %v1638_v43, %v1626_v45  ;;  %3463 = vmatpush3.bf16.msra.mxu1 %v3462_v42  ;;  %v1794_v45 = vld [vmem:[%s4900_s3 + $0x10] sm:$0xff] }
 0x356   :  { %v1642_v53 = vsel %vm1641_vm13, %v1640_v46, %v1629_v49  ;;  %v2598_v49 = vld [vmem:[%s4900_s3 + $0x88] sm:$0xff]  ;;  %3464 = vmatprep.subr.bf16.mxu1 %v3651_v21  ;;  %v1795_v46 = vld [vmem:[%s4900_s3 + $0x18] sm:$0xff] }
 0x357   :  { %v1646_v54 = vrot.slane %v1642_v53, %v1645_v44  ;;  %v3444_v43 = vpack.c.bf16 %v2598_v49, %v2597_v38  ;;  %v3465_v53 = vpack.c.bf16 %v1795_v46, %v1794_v45 }
 0x359   :  { %v4424_v47 = vsub.f32 %v4375_v51, %v1646_v54  ;;  %v4427_v55 = vsub.f32 %v4373_v50, %v1646_v54  ;;  %v4430_v56 = vsub.f32 %v4377_v52, %v1646_v54  ;;  %v4433_v57 = vsub.f32 %v4381_v25, %v1646_v54  ;;  %3445 = vmatpush3.bf16.msra.mxu0 %v3444_v43 }
 0x35a   :  { %v4436_v48 = vsub.f32 %v4387_v58, %v1646_v54  ;;  %v4445_v50 = vsub.f32 %v4393_v35, %v1646_v54  ;;  %v4452_v62 = vsub.f32 %v4397_v32, %v1646_v54  ;;  %3466 = vmatpush3.bf16.msra.mxu1 %v3465_v53  ;;  %3446 = vmatprep.subr.bf16.mxu0 %v3651_v21  ;;  %v2599_v54 = vld [vmem:[%s4900_s3 + $0x90] sm:$0xff] }
 0x35b   :  { %v1654_v59 = vmul.f32 %v4424_v47, %v4424_v47  ;;  %v1655_v60 = vmul.f32 %v4427_v55, %v4427_v55  ;;  %v1656_v51 = vmul.f32 %v4430_v56, %v4430_v56  ;;  %v1657_v52 = vmul.f32 %v4433_v57, %v4433_v57  ;;  %3467 = vmatprep.subr.bf16.mxu1 %v3651_v21 }
 0x35c   :  { %v1658_v63 = vmul.f32 %v4436_v48, %v4436_v48  ;;  %v1659_v35 = vmul.f32 %v4445_v50, %v4445_v50  ;;  %v1660_v31 = vmul.f32 %v4452_v62, %v4452_v62 }
 0x35d   :  { %v1661_v25 = vsel %vm1565_vm7, %v1654_v59, 0.0  ;;  %v1662_v58 = vsel %vm1565_vm7, %v1655_v60, 0.0  ;;  %v1664_v0 = vsel %vm1565_vm7, %v1656_v51, 0.0  ;;  %v1666_v4 = vsel %vm1565_vm7, %v1657_v52, 0.0  ;;  %v2600_v59 = vld [vmem:[%s4900_s3 + $0x98] sm:$0xff]  ;;  %v1796_v51 = vld [vmem:[%s4900_s3 + $0x20] sm:$0xff] }
 0x35e   :  { %v1663_v61 = vadd.f32 %v1662_v58, %v1661_v25  ;;  %v1668_v5 = vsel %vm1565_vm7, %v1658_v63, 0.0  ;;  %v1670_v32 = vsel %vm1565_vm7, %v1659_v35, 0.0  ;;  %v1672_v11 = vsel %vm1565_vm7, %v1660_v31, 0.0  ;;  %v1797_v52 = vld [vmem:[%s4900_s3 + $0x28] sm:$0xff]  ;;  %v2601_v58 = vld [vmem:[%s4900_s3 + $0xa0] sm:$0xff] }
 0x35f   :  { %v3447_v60 = vpack.c.bf16 %v2600_v59, %v2599_v54  ;;  %v3468_v25 = vpack.c.bf16 %v1797_v52, %v1796_v51  ;;  %v1800_v31 = vld [vmem:[%s4900_s3 + $0x40] sm:$0xff] }
 0x360   :  { %v1665_v3 = vadd.f32 %v1664_v0, %v1663_v61  ;;  %v2602_v61 = vld [vmem:[%s4900_s3 + $0xa8] sm:$0xff]  ;;  %v1798_v0 = vld [vmem:[%s4900_s3 + $0x30] sm:$0xff] }
 0x361   :  { %3448 = vmatpush3.bf16.msra.mxu0 %v3447_v60  ;;  %3469 = vmatpush3.bf16.msra.mxu1 %v3468_v25  ;;  %v3450_v63 = vpack.c.bf16 %v2602_v61, %v2601_v58 }
 0x362   :  { %v1667_v2 = vadd.f32 %v1666_v4, %v1665_v3  ;;  %3449 = vmatprep.subr.bf16.mxu0 %v3651_v21  ;;  %3470 = vmatprep.subr.bf16.mxu1 %v3651_v21  ;;  %v1799_v3 = vld [vmem:[%s4900_s3 + $0x38] sm:$0xff]  ;;  %v2603_v4 = vld [vmem:[%s4900_s3 + $0xb0] sm:$0xff] }
 0x363   :  { %v3471_v35 = vpack.c.bf16 %v1799_v3, %v1798_v0 }
 0x364   :  { %v1669_v6 = vadd.f32 %v1668_v5, %v1667_v2  ;;  %v2604_v2 = vld [vmem:[%s4900_s3 + $0xb8] sm:$0xff] }
 0x365   :  { %3451 = vmatpush3.bf16.msra.mxu0 %v3450_v63  ;;  %3472 = vmatpush3.bf16.msra.mxu1 %v3471_v35  ;;  %v3453_v5 = vpack.c.bf16 %v2604_v2, %v2603_v4  ;;  %v2615_v2 = vld [vmem:[%s4900_s3 + $0xe0] sm:$0xff] }
 0x366   :  { %v1671_v10 = vadd.f32 %v1670_v32, %v1669_v6  ;;  %3452 = vmatprep.subr.bf16.mxu0 %v3651_v21  ;;  %3473 = vmatprep.subr.bf16.mxu1 %v3651_v21  ;;  %v1801_v6 = vld [vmem:[%s4900_s3 + $0x48] sm:$0xff]  ;;  %v2605_v32 = vld [vmem:[%s4900_s3 + $0xc0] sm:$0xff] }
 0x368   :  { %v1673_v12 = vadd.f32 %v1672_v11, %v1671_v10  ;;  %v2606_v10 = vld [vmem:[%s4900_s3 + $0xc8] sm:$0xff]  ;;  %v3474_v11 = vpack.c.bf16 %v1801_v6, %v1800_v31  ;;  %v2617_v6 = vld [vmem:[%s4900_s3 + $0xf0] sm:$0xff] }
 0x369   :  { %3454 = vmatpush3.bf16.msra.mxu0 %v3453_v5  ;;  %v2616_v31 = vld [vmem:[%s4900_s3 + $0xe8] sm:$0xff] }
 0x36a   :  { %v1674_v13 = vsel %vm1565_vm7, %v1673_v12, 0.0  ;;  %v1802_v12 = vld [vmem:[%s4900_s3 + $0x50] sm:$0xff]  ;;  %3475 = vmatpush3.bf16.msra.mxu1 %v3474_v11  ;;  %3455 = vmatprep.subr.bf16.mxu0 %v3651_v21  ;;  %v3483_v5 = vpack.c.bf16 %v2616_v31, %v2615_v2  ;;  %v2644_v2 = vld [vmem:[%s4901_s4 + $0xb8] sm:$0xff] }
 0x36b   :  { %v1675_v7 = vrot.slane %v1674_v13, 4  ;;  %3476 = vmatprep.subr.bf16.mxu1 %v3651_v21 }
 0x36d   :  { %v1676_v15 = vadd.f32 %v1675_v7, %v1674_v13  ;;  %v1803_v13 = vld [vmem:[%s4900_s3 + $0x58] sm:$0xff]  ;;  %v3456_v7 = vpack.c.bf16 %v2606_v10, %v2605_v32 }
 0x36e   :  { %v2618_v32 = vld [vmem:[%s4900_s3 + $0xf8] sm:$0xff] }
 0x36f   :  { %v1677_v16 = vrot.slane %v1676_v15, 2  ;;  %3457 = vmatpush3.bf16.msra.mxu0 %v3456_v7  ;;  %v2620_v7 = vld [vmem:[%s4900_s3 + $0x108] sm:$0xff] }
 0x370   :  { %3458 = vmatprep.subr.bf16.mxu0 %v3651_v21 }
 0x371   :  { %v1678_v8 = vadd.f32 %v1677_v16, %v1676_v15  ;;  %v3477_v15 = vpack.c.bf16 %v1803_v13, %v1802_v12  ;;  %v2607_v16 = vld [vmem:[%s4900_s3 + $0xd0] sm:$0xff]  ;;  %v3486_v12 = vpack.c.bf16 %v2618_v32, %v2617_v6  ;;  %v2619_v13 = vld [vmem:[%s4900_s3 + $0x100] sm:$0xff] }
 0x373   :  { %v1679_v17 = vrot.slane %v1678_v8, 1  ;;  %3478 = vmatpush3.bf16.msra.mxu1 %v3477_v15 }
 0x374   :  { %3479 = vmatprep.subr.bf16.mxu1 %v3651_v21 }
 0x375   :  { %v1680_v18 = vadd.f32 %v1679_v17, %v1678_v8  ;;  %v2608_v8 = vld [vmem:[%s4900_s3 + $0xd8] sm:$0xff]  ;;  %v1804_v17 = vld [vmem:[%s4900_s3 + $0x60] sm:$0xff] }
 0x377   :  { %1686 = vrot.lane.b32.xlu1 %v1680_v18, %s3656_s8  ;;  %1682 = vrot.lane.b32.xlu0 %v1680_v18, %s3654_s29 }
 0x37b   :  { %1694 = vrot.lane.b32.xlu1 %v1680_v18, %s3655_s30  ;;  %1690 = vrot.lane.b32.xlu0 %v1680_v18, %s3653_s28 }
 0x37f   :  { %1702 = vrot.lane.b32.xlu1 %v1680_v18, %s3657_s9  ;;  %1698 = vrot.lane.b32.xlu0 %v1680_v18, %s3658_s10 }
 0x3e9   :  { %v1687_v19 = vpop.permute.xlu1 %1686  ;;  %v1683_v20 = vpop.permute.xlu0 %1682 }
 0x3ea   :  { %v1685_v1 = vadd.f32 %v1683_v20, %v1680_v18  ;;  %v1805_v18 = vld [vmem:[%s4900_s3 + $0x68] sm:$0xff] }
 0x3eb   :  { %v3480_v20 = vpack.c.bf16 %v1805_v18, %v1804_v17  ;;  %v2621_v17 = vld [vmem:[%s4900_s3 + $0x110] sm:$0xff]  ;;  %v2622_v18 = vld [vmem:[%s4900_s3 + $0x118] sm:$0xff] }
 0x3ec   :  { %v1689_v22 = vadd.f32 %v1687_v19, %v1685_v1  ;;  %v3459_v19 = vpack.c.bf16 %v2608_v8, %v2607_v16  ;;  %v3489_v8 = vpack.c.bf16 %v2620_v7, %v2619_v13 }
 0x3ed   :  { %v1695_v23 = vpop.permute.xlu1 %1694  ;;  %v1691_v24 = vpop.permute.xlu0 %1690  ;;  %3481 = vmatpush3.bf16.msra.mxu1 %v3480_v20 }
 0x3ee   :  { %v1693_v26 = vadd.f32 %v1691_v24, %v1689_v22  ;;  %3460 = vmatpush3.bf16.msra.mxu0 %v3459_v19  ;;  %3503 = vmatprep.subr.bf16.mxu1 %v3651_v21 }
 0x3ef   :  { %3482 = vmatprep.subr.bf16.mxu0 %v3651_v21 }
 0x3f0   :  { %v1697_v27 = vadd.f32 %v1695_v23, %v1693_v26 }
 0x3f1   :  { %v1699_v28 = vpop.permute.xlu0 %1698  ;;  %v1703_v30 = vpop.permute.xlu1 %1702 }
 0x3f2   :  { %v1701_v29 = vadd.f32 %v1699_v28, %v1697_v27 }
 0x3f4   :  { %v1705_v33 = vadd.f32 %v1703_v30, %v1701_v29 }
 0x3f6   :  { %v4472_v34 = vmul.f32 0.010204081, %v1705_v33 }
 0x3f8   :  { %1711 = vrot.lane.b32.xlu1 %v4472_v34, %s3657_s9  ;;  %1708 = vrot.lane.b32.xlu0 %v4472_v34, %s3659_s11 }
 0x3fc   :  { %1717 = vrot.lane.b32.xlu1 %v4472_v34, %s3655_s30  ;;  %1714 = vrot.lane.b32.xlu0 %v4472_v34, %s3658_s10 }
 0x400   :  { %1723 = vrot.lane.b32.xlu1 %v4472_v34, %s3656_s8  ;;  %1720 = vrot.lane.b32.xlu0 %v4472_v34, %s3653_s28 }
 0x46a   :  { %v1712_v1 = vpop.permute.xlu1 %1711  ;;  %v1709_v22 = vpop.permute.xlu0 %1708 }
 0x46b   :  { %v1726_v23 = vsel %vm1631_vm8, %v4472_v34, %v1709_v22  ;;  %v2623_v22 = vld [vmem:[%s4900_s3 + $0x120] sm:$0xff] }
 0x46c   :  { %v1727_v26 = vsel %vm1633_vm9, %v1726_v23, %v1712_v1  ;;  %v3492_v1 = vpack.c.bf16 %v2622_v18, %v2621_v17  ;;  %v2624_v23 = vld [vmem:[%s4900_s3 + $0x128] sm:$0xff] }
 0x46e   :  { %v1718_v24 = vpop.permute.xlu1 %1717  ;;  %v1715_v27 = vpop.permute.xlu0 %1714 }
 0x46f   :  { %v1728_v28 = vsel %vm1635_vm10, %v1727_v26, %v1715_v27  ;;  %v2625_v26 = vld [vmem:[%s4900_s3 + $0x130] sm:$0xff]  ;;  %v2626_v27 = vld [vmem:[%s4900_s3 + $0x138] sm:$0xff] }
 0x470   :  { %v1729_v30 = vsel %vm1637_vm11, %v1728_v28, %v1718_v24  ;;  %v3495_v24 = vpack.c.bf16 %v2624_v23, %v2623_v22  ;;  %v3498_v28 = vpack.c.bf16 %v2626_v27, %v2625_v26  ;;  %v2632_v22 = vld [vmem:[%s4903_s6 + $0x4] ss:$0 sm:$0xff] }
 0x472   :  { %v1724_v29 = vpop.permute.xlu1 %1723  ;;  %v1721_v33 = vpop.permute.xlu0 %1720 }
 0x473   :  { %v1730_v36 = vsel %vm1639_vm12, %v1729_v30, %v1721_v33  ;;  %v2628_v30 = vld [vmem:[%s4900_s3 + $0x148] sm:$0xff] }
 0x474   :  { %v1731_v37 = vsel %vm1641_vm13, %v1730_v36, %v1724_v29  ;;  %v2627_v29 = vld [vmem:[%s4900_s3 + $0x140] sm:$0xff] }
 0x475   :  { %v1734_v39 = vadd.f32 1e-05, %v1731_v37  ;;  %v3501_v33 = vpack.c.bf16 %v2628_v30, %v2627_v29  ;;  %v2111_v37 = vld [vmem:[%s4901_s4] sm:$0xff] }
 0x477   :  { %3622 = vrsqrt.f32 %v1734_v39  ;;  %v2112_v39 = vld [vmem:[%s4901_s4 + $0x8] sm:$0xff] }
 0x481   :  { %v3623_v40 = vpop.eup %3622 }
 0x482   :  { %v1739_v34 = vrot.slane %v3623_v40, %v1645_v44  ;;  %v2633_v40 = vld [vmem:[%s4901_s4 + $0x60] sm:$0xff] }
 0x484   :  { %v1740_v42 = vmul.f32 %v1739_v34, %v4424_v47  ;;  %v1741_v38 = vmul.f32 %v1739_v34, %v4427_v55  ;;  %v1742_v49 = vmul.f32 %v1739_v34, %v4430_v56  ;;  %v1743_v43 = vmul.f32 %v1739_v34, %v4433_v57 }
 0x485   :  { %v1744_v45 = vmul.f32 %v1739_v34, %v4436_v48  ;;  %v1745_v46 = vmul.f32 %v1739_v34, %v4445_v50  ;;  %v1746_v53 = vmul.f32 %v1739_v34, %v4452_v62  ;;  %v3522_v34 = vpack.c.bf16 %v2112_v39, %v2111_v37 }
 0x486   :  { %v1751_v44 = vmul.f32 %v2593_v41, %v1740_v42  ;;  %v1752_v54 = vmul.f32 %v2593_v41, %v1741_v38  ;;  %v1754_v59 = vmul.f32 %v2593_v41, %v1743_v43  ;;  %v1753_v47 = vmul.f32 %v2593_v41, %v1742_v49  ;;  %v2113_v42 = vld [vmem:[%s4901_s4 + $0x10] sm:$0xff]  ;;  %v2114_v38 = vld [vmem:[%s4901_s4 + $0x18] sm:$0xff] }
 0x487   :  { %v1756_v60 = vmul.f32 %v2593_v41, %v1745_v46  ;;  %v1755_v55 = vmul.f32 %v2593_v41, %v1744_v45  ;;  %v1757_v51 = vmul.f32 %v2593_v41, %v1746_v53  ;;  %v2634_v41 = vld [vmem:[%s4901_s4 + $0x68] sm:$0xff]  ;;  %v2635_v43 = vld [vmem:[%s4901_s4 + $0x70] sm:$0xff]  ;;  %v2636_v45 = vld [vmem:[%s4901_s4 + $0x78] sm:$0xff]  ;;  %v3525_v46 = vpack.c.bf16 %v2114_v38, %v2113_v42 }
 0x488   :  { %v1763_v56 = vadd.f32 %v2594_v14, %v1752_v54  ;;  %v1762_v52 = vadd.f32 %v2594_v14, %v1751_v44  ;;  %v1765_v57 = vadd.f32 %v2594_v14, %v1754_v59  ;;  %v1764_v25 = vadd.f32 %v2594_v14, %v1753_v47  ;;  %v2116_v44 = vld [vmem:[%s4901_s4 + $0x28] sm:$0xff]  ;;  %v2637_v54 = vld [vmem:[%s4901_s4 + $0x80] sm:$0xff]  ;;  %v2649_v38 = vld [vmem:[%s4901_s4 + $0xd0] sm:$0xff] }
 0x489   :  { %v1767_v48 = vadd.f32 %v2594_v14, %v1756_v60  ;;  %v1766_v58 = vadd.f32 %v2594_v14, %v1755_v55  ;;  %v1768_v50 = vadd.f32 %v2594_v14, %v1757_v51  ;;  %v3504_v49 = vpack.c.bf16 %v2634_v41, %v2633_v40  ;;  %v2115_v14 = vld [vmem:[%s4901_s4 + $0x20] sm:$0xff]  ;;  %v2638_v59 = vld [vmem:[%s4901_s4 + $0x88] sm:$0xff]  ;;  %v2117_v55 = vld [vmem:[%s4901_s4 + $0x30] sm:$0xff] }
 0x48a   :  { %v1770_v61 = vmax.f32 %v1763_v56, 0.0  ;;  %v1769_v62 = vmax.f32 %v1762_v52, 0.0  ;;  %v1772_v63 = vmax.f32 %v1765_v57, 0.0  ;;  %v1771_v0 = vmax.f32 %v1764_v25, 0.0  ;;  %v2118_v51 = vld [vmem:[%s4901_s4 + $0x38] sm:$0xff]  ;;  %v2639_v56 = vld [vmem:[%s4901_s4 + $0x90] sm:$0xff] }
 0x48b   :  { %v1774_v3 = vmax.f32 %v1767_v48, 0.0  ;;  %v1773_v35 = vmax.f32 %v1766_v58, 0.0  ;;  %v1775_v4 = vmax.f32 %v1768_v50, 0.0  ;;  %v3507_v53 = vpack.c.bf16 %v2636_v45, %v2635_v43  ;;  %v2640_v52 = vld [vmem:[%s4901_s4 + $0x98] sm:$0xff]  ;;  %v2119_v48 = vld [vmem:[%s4901_s4 + $0x40] sm:$0xff]  ;;  %v2120_v58 = vld [vmem:[%s4901_s4 + $0x48] sm:$0xff] }
 0x48c   :  { %1779 = vst.msk [vmem:[#allocation4 + $0x8] sm:$0xff] %vm1123_vm5, %v1770_v61  ;;  %1778 = vst.msk [vmem:[#allocation4] sm:$0xff] %vm1123_vm5, %v1769_v62  ;;  %v3528_v47 = vpack.c.bf16 %v2116_v44, %v2115_v14  ;;  %v3510_v60 = vpack.c.bf16 %v2638_v59, %v2637_v54  ;;  %v3531_v57 = vpack.c.bf16 %v2118_v51, %v2117_v55  ;;  %v2641_v61 = vld [vmem:[%s4901_s4 + $0xa0] sm:$0xff]  ;;  %v2642_v62 = vld [vmem:[%s4901_s4 + $0xa8] sm:$0xff] }
 0x48d   :  { %1781 = vst.msk [vmem:[#allocation4 + $0x18] sm:$0xff] %vm1123_vm5, %v1772_v63  ;;  %1780 = vst.msk [vmem:[#allocation4 + $0x10] sm:$0xff] %vm1123_vm5, %v1771_v0  ;;  %v3513_v25 = vpack.c.bf16 %v2640_v52, %v2639_v56  ;;  %v3534_v50 = vpack.c.bf16 %v2120_v58, %v2119_v48  ;;  %v3516_v63 = vpack.c.bf16 %v2642_v62, %v2641_v61  ;;  %v2121_v0 = vld [vmem:[%s4901_s4 + $0x50] sm:$0xff]  ;;  %v2651_v45 = vld [vmem:[%s4901_s4 + $0xe0] sm:$0xff] }
 0x48e   :  { %1783 = vst.msk [vmem:[#allocation4 + $0x28] sm:$0xff] %vm1123_vm5, %v1774_v3  ;;  %1782 = vst.msk [vmem:[#allocation4 + $0x20] sm:$0xff] %vm1123_vm5, %v1773_v35  ;;  %v2122_v3 = vld [vmem:[%s4901_s4 + $0x58] sm:$0xff]  ;;  %v2653_v14 = vld [vmem:[%s4901_s4 + $0xf0] sm:$0xff] }
 0x48f   :  { %1784 = vst.msk [vmem:[#allocation4 + $0x30] sm:$0xff] %vm1123_vm5, %v1775_v4  ;;  %v3537_v35 = vpack.c.bf16 %v2122_v3, %v2121_v0  ;;  %v2643_v4 = vld [vmem:[%s4901_s4 + $0xb0] sm:$0xff]  ;;  %v2655_v54 = vld [vmem:[%s4901_s4 + $0x100] sm:$0xff]  ;;  %v2656_v59 = vld [vmem:[%s4901_s4 + $0x108] sm:$0xff] }
 0x490   :  { %v3519_v31 = vpack.c.bf16 %v2644_v2, %v2643_v4  ;;  %v2658_v55 = vld [vmem:[%s4901_s4 + $0x118] sm:$0xff]  ;;  %v2378_v58 = vld [vmem:[%s4902_s5 + $0x10] sm:$0xff]  ;;  %v2380_v61 = vld [vmem:[%s4902_s5 + $0x20] sm:$0xff] }
 0x491   :  { %v2382_v3 = vld [vmem:[%s4902_s5 + $0x30] sm:$0xff]  ;;  %v2384_v2 = vld [vmem:[%s4902_s5 + $0x40] sm:$0xff] }
 0x493   :  { %v1786_v10 = vld [vmem:[#allocation4 + $0x8] sm:$0xff]  ;;  %v1785_v11 = vld [vmem:[#allocation4] sm:$0xff] }
 0x494   :  { %3149 = vmatmul.mubr.msk.f32.vlgmr.msra.gmra.mrb[14].mxu0 %vm1123_vm5, %v1786_v10  ;;  %3186 = vmatmul.mubr.msk.f32.vlgmr.msra.gmra.mrb[56].mxu1 %vm1123_vm5, %v1785_v11  ;;  %v1788_v15 = vld [vmem:[#allocation4 + $0x18] sm:$0xff]  ;;  %v1787_v16 = vld [vmem:[#allocation4 + $0x10] sm:$0xff] }
 0x495   :  { %3484 = vmatpush3.bf16.msra.mxu0 %v3483_v5  ;;  %3151 = vmatprep.mubr.msk.f32.mxu0 %vm3652_vm6, %v3649_v9  ;;  %v1790_v19 = vld [vmem:[#allocation4 + $0x28] sm:$0xff]  ;;  %v1789_v20 = vld [vmem:[#allocation4 + $0x20] sm:$0xff] }
 0x496   :  { %3188 = vmatprep.mubr.msk.f32.mxu1 %vm3652_vm6, %v3649_v9  ;;  %3485 = vmatprep.subr.bf16.mxu0 %v3651_v21  ;;  %v1791_v36 = vld [vmem:[#allocation4 + $0x30] sm:$0xff] }
 0x497   :  { %3505 = vmatpush3.bf16.msra.mxu1 %v3504_v49  ;;  %v2650_v49 = vld [vmem:[%s4901_s4 + $0xd8] sm:$0xff] }
 0x498   :  { %3152 = vmatmul.mubr.msk.f32.gmra.mrb[16].mxu0 %vm1123_vm5, %v1788_v15  ;;  %3189 = vmatmul.mubr.msk.f32.gmra.mrb[58].mxu1 %vm1123_vm5, %v1787_v16  ;;  %v3543_v43 = vpack.c.bf16 %v2650_v49, %v2649_v38 }
 0x499   :  { %3487 = vmatpush3.bf16.msra.mxu0 %v3486_v12  ;;  %3154 = vmatprep.mubr.msk.f32.mxu0 %vm3652_vm6, %v3649_v9 }
 0x49a   :  { %3191 = vmatprep.mubr.msk.f32.mxu1 %vm3652_vm6, %v3649_v9  ;;  %3488 = vmatprep.subr.bf16.mxu0 %v3651_v21 }
 0x49b   :  { %3506 = vmatprep.subr.bf16.mxu1 %v3651_v21 }
 0x49c   :  { %3155 = vmatmul.mubr.msk.f32.gmra.mrb[18].mxu0 %vm1123_vm5, %v1790_v19  ;;  %3192 = vmatmul.mubr.msk.f32.gmra.mrb[60].mxu1 %vm1123_vm5, %v1789_v20 }
 0x49d   :  { %3490 = vmatpush3.bf16.msra.mxu0 %v3489_v8  ;;  %3222 = vmatprep.mubr.msk.f32.mxu0 %vm3652_vm6, %v3649_v9 }
 0x49e   :  { %3491 = vmatprep.subr.bf16.mxu0 %v3651_v21  ;;  %3255 = vmatprep.mubr.msk.f32.mxu1 %vm3652_vm6, %v3649_v9 }
 0x49f   :  { %3508 = vmatpush3.bf16.msra.mxu1 %v3507_v53 }
 0x4a0   :  { %3509 = vmatprep.subr.bf16.mxu1 %v3651_v21 }
 0x4a1   :  { %3493 = vmatpush3.bf16.msra.mxu0 %v3492_v1 }
 0x4a2   :  { %3494 = vmatprep.subr.bf16.mxu0 %v3651_v21 }
 0x4a3   :  { %3511 = vmatpush3.bf16.msra.mxu1 %v3510_v60  ;;  %v2657_v60 = vld [vmem:[%s4901_s4 + $0x110] sm:$0xff] }
 0x4a4   :  { %3512 = vmatprep.subr.bf16.mxu1 %v3651_v21  ;;  %v3555_v51 = vpack.c.bf16 %v2658_v55, %v2657_v60 }
 0x4a5   :  { %3496 = vmatpush3.bf16.msra.mxu0 %v3495_v24 }
 0x4a6   :  { %3497 = vmatprep.subr.bf16.mxu0 %v3651_v21 }
 0x4a7   :  { %3514 = vmatpush3.bf16.msra.mxu1 %v3513_v25  ;;  %v2377_v25 = vld [vmem:[%s4902_s5 + $0x8] sm:$0xff] }
 0x4a8   :  { %3515 = vmatprep.subr.bf16.mxu1 %v3651_v21 }
 0x4a9   :  { %3499 = vmatpush3.bf16.msra.mxu0 %v3498_v28 }
 0x4aa   :  { %3500 = vmatprep.subr.bf16.mxu0 %v3651_v21 }
 0x4ab   :  { %3517 = vmatpush3.bf16.msra.mxu1 %v3516_v63  ;;  %v2381_v63 = vld [vmem:[%s4902_s5 + $0x28] sm:$0xff] }
 0x4ac   :  { %3518 = vmatprep.subr.bf16.mxu1 %v3651_v21  ;;  %v3564_v0 = vpack.c.bf16 %v2381_v63, %v2380_v61 }
 0x4ad   :  { %3502 = vmatpush3.bf16.msra.mxu0 %v3501_v33  ;;  %v2647_v33 = vld [vmem:[%s4901_s4 + $0xc0] sm:$0xff] }
 0x4ae   :  { %3521 = vmatprep.subr.bf16.mxu0 %v3651_v21 }
 0x4af   :  { %3520 = vmatpush3.bf16.msra.mxu1 %v3519_v31  ;;  %v2385_v31 = vld [vmem:[%s4902_s5 + $0x48] sm:$0xff] }
 0x4b0   :  { %3223 = vmatmul.mubr.msk.f32.vlgmr.msra.gmra.mrb[20].mxu0 %vm1123_vm5, %v1787_v16  ;;  %3539 = vmatprep.subr.bf16.mxu1 %v3651_v21 }
 0x4b1   :  { %3225 = vmatprep.mubr.msk.f32.mxu0 %vm3652_vm6, %v3649_v9  ;;  %3523 = vmatpush3.bf16.msra.mxu0 %v3522_v34 }
 0x4b2   :  { %3524 = vmatprep.subr.bf16.mxu0 %v3651_v21 }
 0x4b4   :  { %3226 = vmatmul.mubr.msk.f32.gmra.mrb[22].mxu0 %vm1123_vm5, %v1789_v20 }
 0x4b5   :  { %3228 = vmatprep.mubr.msk.f32.mxu0 %vm3652_vm6, %v3649_v9  ;;  %3526 = vmatpush3.bf16.msra.mxu0 %v3525_v46  ;;  %v2652_v46 = vld [vmem:[%s4901_s4 + $0xe8] sm:$0xff] }
 0x4b6   :  { %3527 = vmatprep.subr.bf16.mxu0 %v3651_v21  ;;  %v3546_v53 = vpack.c.bf16 %v2652_v46, %v2651_v45 }
 0x4b8   :  { %3229 = vmatmul.mubr.msk.f32.gmra.mrb[24].mxu0 %vm1123_vm5, %v1791_v36  ;;  %v2648_v36 = vld [vmem:[%s4901_s4 + $0xc8] sm:$0xff] }
 0x4b9   :  { %3282 = vmatprep.mubr.msk.f32.mxu0 %vm3652_vm6, %v3649_v9  ;;  %3529 = vmatpush3.bf16.msra.mxu0 %v3528_v47  ;;  %v3540_v40 = vpack.c.bf16 %v2648_v36, %v2647_v33  ;;  %v3552_v47 = vpack.c.bf16 %v2656_v59, %v2655_v54 }
 0x4ba   :  { %3530 = vmatprep.subr.bf16.mxu0 %v3651_v21 }
 0x4bd   :  { %3532 = vmatpush3.bf16.msra.mxu0 %v3531_v57  ;;  %v2376_v57 = vld [vmem:[%s4902_s5] sm:$0xff] }
 0x4be   :  { %3533 = vmatprep.subr.bf16.mxu0 %v3651_v21  ;;  %v3558_v48 = vpack.c.bf16 %v2377_v25, %v2376_v57 }
 0x4c1   :  { %3535 = vmatpush3.bf16.msra.mxu0 %v3534_v50  ;;  %v2379_v50 = vld [vmem:[%s4902_s5 + $0x18] sm:$0xff] }
 0x4c2   :  { %3536 = vmatprep.subr.bf16.mxu0 %v3651_v21  ;;  %v3561_v62 = vpack.c.bf16 %v2379_v50, %v2378_v58 }
 0x4c5   :  { %3538 = vmatpush3.bf16.msra.mxu0 %v3537_v35  ;;  %v2383_v35 = vld [vmem:[%s4902_s5 + $0x38] sm:$0xff] }
 0x4c6   :  { %3557 = vmatprep.subr.bf16.mxu0 %v3651_v21  ;;  %v3567_v4 = vpack.c.bf16 %v2383_v35, %v2382_v3 }
 0x567   :  { %v1896_v5 = vpop.f32.mrb[14].mxu0  ;;  %v1985_v6 = vpop.f32.mrb[56].mxu1 }
 0x568   :  { %v1986_v32 = vadd.f32 %v1985_v6, %v1896_v5  ;;  %v3150_v10 = vpop.f32.mrb[15].mxu0  ;;  %v3187_v11 = vpop.f32.mrb[57].mxu1  ;;  %v3570_v5 = vpack.c.bf16 %v2385_v31, %v2384_v2  ;;  %v2386_v6 = vld [vmem:[%s4902_s5 + $0x50] sm:$0xff] }
 0x569   :  { %v2388_v11 = vld [vmem:[%s4902_s5 + $0x60] sm:$0xff] }
 0x56b   :  { %v1901_v12 = vpop.f32.mrb[16].mxu0  ;;  %v1990_v13 = vpop.f32.mrb[58].mxu1 }
 0x56c   :  { %v1991_v7 = vadd.f32 %v1990_v13, %v1901_v12  ;;  %v3153_v15 = vpop.f32.mrb[17].mxu0  ;;  %v3190_v16 = vpop.f32.mrb[59].mxu1  ;;  %v2389_v12 = vld [vmem:[%s4902_s5 + $0x68] sm:$0xff] }
 0x56d   :  { %v3576_v13 = vpack.c.bf16 %v2389_v12, %v2388_v11  ;;  %v2391_v15 = vld [vmem:[%s4902_s5 + $0x78] sm:$0xff] }
 0x56f   :  { %v1906_v8 = vpop.f32.mrb[18].mxu0  ;;  %v1995_v17 = vpop.f32.mrb[60].mxu1 }
 0x570   :  { %v1996_v18 = vadd.f32 %v1995_v17, %v1906_v8  ;;  %v3156_v19 = vpop.f32.mrb[19].mxu0  ;;  %v3193_v20 = vpop.f32.mrb[61].mxu1 }
 0x583   :  { %v2083_v1 = vpop.f32.mrb[20].mxu0 }
 0x584   :  { %v2097_v23 = vadd.f32 %v2083_v1, %v1986_v32  ;;  %v3224_v24 = vpop.f32.mrb[21].mxu0  ;;  %v2387_v32 = vld [vmem:[%s4902_s5 + $0x58] sm:$0xff] }
 0x585   :  { %v3573_v10 = vpack.c.bf16 %v2387_v32, %v2386_v6 }
 0x586   :  { %v2105_v26 = vadd.f32 %v2632_v22, %v2097_v23 }
 0x587   :  { %v2088_v27 = vpop.f32.mrb[22].mxu0 }
 0x588   :  { %v2108_v28 = vmax.f32 %v2105_v26, 0.0  ;;  %v2098_v29 = vadd.f32 %v2088_v27, %v1991_v7  ;;  %v3227_v30 = vpop.f32.mrb[23].mxu0  ;;  %v2390_v7 = vld [vmem:[%s4902_s5 + $0x70] sm:$0xff]  ;;  %v2661_v27 = vld [vmem:[%s4903_s6 + $0x6] ss:$0 sm:$0xff]  ;;  %s3660_s5 = smov [#allocation5]  }
 0x589   :  { %v3579_v16 = vpack.c.bf16 %v2391_v15, %v2390_v7  ;;  %s2475_s3 = sshll.u32 %s3660_s5, 4  ;;  %s2476_s3 = int_to_ptr.vmem [resolvable:$true] %s2475_s3 }
 0x58a   :  { %v2106_v37 = vadd.f32 %v2632_v22, %v2098_v29  ;;  %3283 = vmatmul.mubr.msk.f32.vlgmr.msra.gmra.mrb[26].mxu0 %vm1641_vm13, %v2108_v28  ;;  %s3624_s20 = scalar_lea.vmem %s2476_s3, 32  ;;  %p3629_p1 = scmp.lt.s32.totalorder %s2476_s3, %s2476_s3 }
 0x58b   :  { %v2093_v39 = vpop.f32.mrb[24].mxu0  ;;  %3344 = vmatprep.mubr.msk.f32.mxu0 %vm3652_vm6, %v3649_v9  ;;  %3559 = vmatpush3.bf16.msra.mxu0 %v3558_v48  ;;  %p3625_p0 = scmp.ne.s32.totalorder %s2476_s3, %s3624_s20  ;;  %p3630_p2 = scmp.lt.s32.totalorder %s3624_s20, %s3624_s20 }
 0x58c   :  { %v2109_v34 = vmax.f32 %v2106_v37, 0.0  ;;  %v2099_v41 = vadd.f32 %v2093_v39, %v1996_v18  ;;  %v3230_v42 = vpop.f32.mrb[25].mxu0  ;;  %3560 = vmatprep.subr.bf16.mxu0 %v3651_v21 }
 0x58d   :  { %p3631_p3 = por %p3630_p2, %p3629_p1 }
 0x58e   :  { %3256 = vmatmul.mubr.msk.f32.vlgmr.msra.gmra.mrb[62].mxu1 %vm1641_vm13, %v2109_v34  ;;  %v2107_v56 = vadd.f32 %v2632_v22, %v2099_v41 }
 0x58f   :  { %3541 = vmatpush3.bf16.msra.mxu1 %v3540_v40  ;;  %3309 = vmatprep.mubr.msk.f32.mxu1 %vm3652_vm6, %v3649_v9  ;;  %v2654_v9 = vld [vmem:[%s4901_s4 + $0xf8] sm:$0xff]  ;;  %p3632_p4 = pnand %p3631_p3, %p3625_p0 }
 0x590   :  { %3542 = vmatprep.subr.bf16.mxu1 %v3651_v21  ;;  %v3549_v44 = vpack.c.bf16 %v2654_v9, %v2653_v14  ;;  %v2110_v52 = vmax.f32 %v2107_v56, 0.0  ;;  %3562 = vmatpush3.bf16.msra.mxu0 %v3561_v62 }
 0x591   :  { %3563 = vmatprep.subr.bf16.mxu0 %v3651_v21 }
 0x593   :  { %3544 = vmatpush3.bf16.msra.mxu1 %v3543_v43 }
 0x594   :  { %3545 = vmatprep.subr.bf16.mxu1 %v3651_v21  ;;  %3565 = vmatpush3.bf16.msra.mxu0 %v3564_v0 }
 0x595   :  { %3566 = vmatprep.subr.bf16.mxu0 %v3651_v21 }
 0x597   :  { %3547 = vmatpush3.bf16.msra.mxu1 %v3546_v53 }
 0x598   :  { %3548 = vmatprep.subr.bf16.mxu1 %v3651_v21  ;;  %3568 = vmatpush3.bf16.msra.mxu0 %v3567_v4 }
 0x599   :  { %3569 = vmatprep.subr.bf16.mxu0 %v3651_v21 }
 0x59b   :  { %3550 = vmatpush3.bf16.msra.mxu1 %v3549_v44 }
 0x59c   :  { %3551 = vmatprep.subr.bf16.mxu1 %v3651_v21  ;;  %3571 = vmatpush3.bf16.msra.mxu0 %v3570_v5 }
 0x59d   :  { %3572 = vmatprep.subr.bf16.mxu0 %v3651_v21 }
 0x59f   :  { %3553 = vmatpush3.bf16.msra.mxu1 %v3552_v47 }
 0x5a0   :  { %3554 = vmatprep.subr.bf16.mxu1 %v3651_v21  ;;  %3574 = vmatpush3.bf16.msra.mxu0 %v3573_v10 }
 0x5a1   :  { %3575 = vmatprep.subr.bf16.mxu0 %v3651_v21 }
 0x5a3   :  { %3556 = vmatpush3.bf16.msra.mxu1 %v3555_v51 }
 0x5a4   :  { %3577 = vmatpush3.bf16.msra.mxu0 %v3576_v13 }
 0x5a5   :  { %3578 = vmatprep.subr.bf16.mxu0 %v3651_v21  ;;  %v2660_v21 = vld [vmem:[%s4903_s6 + $0x5] ss:$0 sm:$0xff] }
 0x5a6   :  { %3310 = vmatmul.mubr.msk.f32.vlgmr.msra.gmra.mrb[64].mxu1 %vm1641_vm13, %v2110_v52 }
 0x5a8   :  { %3580 = vmatpush3.bf16.msra.mxu0 %v3579_v16 }
 0x65d   :  { %v2278_v8 = vpop.f32.mrb[26].mxu0 }
 0x65e   :  { %v3284_v17 = vpop.f32.mrb[27].mxu0 }
 0x661   :  { %v2205_v18 = vpop.f32.mrb[62].mxu1 }
 0x662   :  { %v2279_v19 = vadd.f32 %v2278_v8, %v2205_v18  ;;  %v3257_v20 = vpop.f32.mrb[63].mxu1 }
 0x679   :  { %v2364_v1 = vpop.f32.mrb[64].mxu1 }
 0x67a   :  { %v2368_v22 = vadd.f32 %v2364_v1, %v2279_v19  ;;  %v3311_v23 = vpop.f32.mrb[65].mxu1 }
 0x67c   :  { %v2374_v24 = vadd.f32 %v2660_v21, %v2368_v22 }
 0x67e   :  { %v2375_v26 = vmax.f32 %v2374_v24, 0.0 }
 0x680   :  { %3345 = vmatmul.mubr.f32.vlgmr.msra.gmra.mrb[28].mxu0 %v2375_v26 }
 0x753   :  { %v2463_v28 = vpop.f32.mrb[28].mxu0 }
 0x754   :  { %v2464_v29 = vadd.f32 %v2661_v27, %v2463_v28  ;;  %v3346_v30 = vpop.f32.mrb[29].mxu0 }
 0x756   :  { %2468 = vst.msk [vmem:[#allocation5] sm:$0x3] %vm2467_vm14, %v2464_v29 }
 0x757   :  { %3635 = shalt.err (!%p3632_p4)
}
 0x758   :  { %s3636_s23 = scalar_lea.hbm %s4904_s7, 32 }
 0x759   :  { %p3637_p5 = scmp.ne.s32.totalorder %s4904_s7, %s3636_s23  ;;  %p3640_p6 = scmp.lt.u32.totalorder %s3636_s23, %s4904_s7 }
 0x75b   :  { %p3642_p7 = pnand %p3640_p6, %p3637_p5 }
 0x75d   :  { %3645 = shalt.err (!%p3642_p7)
}
 0x75e   :  { %2478 = dma.vmem_to_hbm [thread:$0]  %s2476_s3, 32, %s4904_s7, [#allocation6]  }
 0x75f   :  { %3646 = dma.done.wait [#allocation6], 32  }
 0x760   :  { %3647 = vsyncadd [#allocation6], 4294967264 }
 0x761   :  { %2482 = vsyncpa [#allocation6], 1 }

</bundles_post_ra>
